<compile_context>
chip_gen: v6e
topology: v6e:2x2x1
jax: 0.10.0
libtpu: 0.0.40
codegen_flags: <defaults>
</compile_context>

<pallas_src>
import functools

import jax
import jax.numpy as jnp
from jax.experimental import pallas as pl
from jax.experimental.pallas import tpu as pltpu


def _make_kernel(K, L, E, F, Bb, pad):
    Lout = L + 2 * pad - K + 1            # == L for K == 3 (PyTorch padding=(K-2, 0))
    Lpad = L + 2 * pad

    def kernel(x_ref, wc_ref, bc_ref, pq_ref, wq_ref, bq_ref, out_ref, xpad_sc):
        # ---- Build the zero-padded (halo) copy of this batch tile in VMEM scratch ----
        # xpad_sc: (Bb, Lpad, E).  Halo rows are re-zeroed every step (cheap: 2*pad rows) so the
        # kernel stays correct regardless of how the parallel grid is split across TensorCores.
        if pad > 0:
            halo = jnp.zeros((Bb, pad, E), jnp.float32)
            xpad_sc[:, :pad, :] = halo
            xpad_sc[:, L + pad:L + 2 * pad, :] = halo
        xpad_sc[:, pad:pad + L, :] = x_ref[...]

        # ---- Conv1d(1, F, kernel=(K, E), padding=(K-2, 0)) over the (seq, emb) plane ----
        # K shifted taps, each flattened to an (Bb*Lout, E) x (E, F) bf16 matmul on the MXU,
        # accumulated in f32.
        acc = jnp.zeros((Bb * Lout, F), jnp.float32)
        for dk in range(K):                                   # static unroll
            lhs = xpad_sc[:, dk:dk + Lout, :].reshape(Bb * Lout, E).astype(jnp.bfloat16)
            acc = acc + jnp.dot(lhs, wc_ref[dk].astype(jnp.bfloat16),
                                preferred_element_type=jnp.float32)
        ctx = jnp.maximum(acc + bc_ref[...], 0.0)             # bias + ReLU, (Bb*Lout, F)
        ctx3 = ctx.reshape(Bb, Lout, F)                       # (Bb, Lout, F)

        # ---- PersonalisedAttentionWu, batched over the Bb tile ----
        # project preference query: tanh(Linear(pref_q))      -> (Bb, F)
        q = jnp.tanh(
            jnp.dot(pq_ref[...], wq_ref[...], preferred_element_type=jnp.float32)
            + bq_ref[...])
        # attention scores over sequence positions, softmax along seq
        scores = jnp.sum(ctx3 * q[:, None, :], axis=-1)       # (Bb, Lout)
        m = jnp.max(scores, axis=-1, keepdims=True)
        e = jnp.exp(scores - m)
        denom = jnp.sum(e, axis=-1, keepdims=True)
        attn = e * pl.reciprocal(denom, approx=True)          # (Bb, Lout), EUP reciprocal
        # attention-weighted sum of contextual reps -> lane-dense (Bb, F) output slab
        out_ref[...] = jnp.sum(ctx3 * attn[:, :, None], axis=1).astype(out_ref.dtype)

    return kernel


@functools.partial(jax.jit, static_argnames=("kernel_size", "block_b"))
def npa_cnn_forward(embedded_news, pref_query, params, kernel_size=3, block_b=8):
    """embedded_news: (B, L, E) f32, pref_query: (B, Dq) f32 -> (B, F) f32."""
    B, L, E = embedded_news.shape
    Dq = pref_query.shape[-1]
    K = kernel_size
    F = params["w_conv"].shape[-1]
    pad = K - 2
    Lpad = L + 2 * pad

    # Batch tile: Bb items per grid step (keeps >= 2 grid steps for megacore when B allows).
    Bb = max(1, min(block_b, B))
    nb = -(-B // Bb)                      # ceil(B / Bb)
    Bp = nb * Bb

    x = embedded_news.astype(jnp.float32)
    pq = pref_query.astype(jnp.float32)
    if Bp != B:
        # TODO(synk): batch remainder is handled by zero-padding the batch; padded rows produce a
        # harmless uniform softmax and are sliced off below.
        x = jnp.pad(x, ((0, Bp - B), (0, 0), (0, 0)))
        pq = jnp.pad(pq, ((0, Bp - B), (0, 0)))

    out = pl.pallas_call(
        _make_kernel(K, L, E, F, Bb, pad),
        out_shape=jax.ShapeDtypeStruct((Bp, F), jnp.float32),
        grid=(nb,),
        in_specs=[
            pl.BlockSpec((Bb, L, E), lambda i: (i, 0, 0)),     # news embeddings (unpadded)
            pl.BlockSpec((K, E, F), lambda i: (0, 0, 0)),      # conv weights
            pl.BlockSpec((1, F), lambda i: (0, 0)),            # conv bias
            pl.BlockSpec((Bb, Dq), lambda i: (i, 0)),          # preference queries
            pl.BlockSpec((Dq, F), lambda i: (0, 0)),           # pref-query projection weight
            pl.BlockSpec((1, F), lambda i: (0, 0)),            # pref-query projection bias
        ],
        out_specs=pl.BlockSpec((Bb, F), lambda i: (i, 0)),
        scratch_shapes=[pltpu.VMEM((Bb, Lpad, E), jnp.float32)],   # halo-padded input tile
        compiler_params=pltpu.CompilerParams(
            dimension_semantics=("parallel",),
            vmem_limit_bytes=32 * 1024 * 1024,
        ),
    )(x, params["w_conv"], params["b_conv"], pq, params["w_q"], params["b_q"])
    return out[:B]


def ref_forward(embedded_news, pref_query, params, kernel_size=3):
    """Plain-JAX reference mirroring the PyTorch forward (eval mode), full f32."""
    B, L, E = embedded_news.shape
    K = kernel_size
    pad = K - 2
    Lout = L + 2 * pad - K + 1
    xpad = jnp.pad(embedded_news, ((0, 0), (pad, pad), (0, 0)))
    wc = params["w_conv"]                                     # (K, E, F)
    conv = sum(jnp.einsum("ble,ef->blf", xpad[:, dk:dk + Lout, :], wc[dk])
               for dk in range(K)) + params["b_conv"]
    ctx = jax.nn.relu(conv)                                   # (B, Lout, F)
    q = jnp.tanh(pref_query @ params["w_q"] + params["b_q"])  # (B, F)
    scores = jnp.einsum("blf,bf->bl", ctx, q)
    attn = jax.nn.softmax(scores, axis=-1)
    return jnp.einsum("blf,bl->bf", ctx, attn)


def init_params(key, word_emb_dim, n_filters, dim_pref_q, kernel_size):
    k1, k2, k3, k4 = jax.random.split(key, 4)
    # Conv1d weight in PyTorch is (F, 1, K, E); stored here as (K, E, F).
    w_conv = 0.1 * jax.random.normal(k1, (kernel_size, word_emb_dim, n_filters), jnp.float32)
    b_conv = 0.1 * jax.random.normal(k2, (1, n_filters), jnp.float32)
    # Linear(dim_pref_q -> n_filters) weight is (F, Dq) in PyTorch; stored here as (Dq, F).
    w_q = 0.1 * jax.random.normal(k3, (dim_pref_q, n_filters), jnp.float32)
    b_q = 0.1 * jax.random.normal(k4, (1, n_filters), jnp.float32)
    return {"w_conv": w_conv, "b_conv": b_conv, "w_q": w_q, "b_q": b_q}


if __name__ == "__main__":
    # Small, module-consistent shapes; B=16 with Bb=8 gives a 2-step parallel grid.
    B, L, E = 16, 16, 32         # batch, words per news item, word_emb_dim
    F, Dq, K = 64, 32, 3         # n_filters, dim_pref_q, kernel_size

    key = jax.random.PRNGKey(0)
    kx, kq, kp = jax.random.split(key, 3)
    embedded_news = jax.random.normal(kx, (B, L, E), jnp.float32)
    pref_query = jax.random.normal(kq, (B, Dq), jnp.float32)
    params = init_params(kp, E, F, Dq, K)

    out = npa_cnn_forward(embedded_news, pref_query, params, kernel_size=K, block_b=8)
    out = jax.block_until_ready(out)

    ref = ref_forward(embedded_news, pref_query, params, kernel_size=K)
    assert out.shape == (B, F), out.shape
    # Tolerance loosened vs. the pure-f32 version because the conv matmuls feed the MXU in bf16
    # (f32 accumulation) and the softmax uses the approximate EUP reciprocal.
    err = float(jnp.max(jnp.abs(out - ref)))
    scale = float(jnp.max(jnp.abs(ref)))
    assert err <= 5e-2 * max(1.0, scale), (err, scale)
    print("KERNEL_OK")
</pallas_src>

<mosaic_0001>
module attributes {stable_mosaic.version = 11 : i64} {
  func.func @kernel(%arg0: i32, %arg1: memref<8x16x32xf32, #tpu.memory_space<vmem>>, %arg2: memref<3x32x64xf32, #tpu.memory_space<vmem>>, %arg3: memref<1x64xf32, #tpu.memory_space<vmem>>, %arg4: memref<8x32xf32, #tpu.memory_space<vmem>>, %arg5: memref<32x64xf32, #tpu.memory_space<vmem>>, %arg6: memref<1x64xf32, #tpu.memory_space<vmem>>, %arg7: memref<8x64xf32, #tpu.memory_space<vmem>>, %arg8: memref<8x18x32xf32, #tpu.memory_space<vmem>>) attributes {dimension_semantics = [#tpu.dimension_semantics<parallel>], iteration_bounds = array<i64: 2>, scalar_prefetch = 0 : i64, scratch_operands = 1 : i64, tpu.core_type = #tpu.core_type<tc>, window_params = [{transform_indices = @transform_0, window_bounds = array<i64: 8, 16, 32>}, {pipeline_mode = #tpu.pipeline_mode<synchronous>, transform_indices = @transform_1, window_bounds = array<i64: 3, 32, 64>}, {pipeline_mode = #tpu.pipeline_mode<synchronous>, transform_indices = @transform_2, window_bounds = array<i64: 1, 64>}, {transform_indices = @transform_3, window_bounds = array<i64: 8, 32>}, {pipeline_mode = #tpu.pipeline_mode<synchronous>, transform_indices = @transform_4, window_bounds = array<i64: 32, 64>}, {pipeline_mode = #tpu.pipeline_mode<synchronous>, transform_indices = @transform_5, window_bounds = array<i64: 1, 64>}, {transform_indices = @transform_6, window_bounds = array<i64: 8, 64>}]} {
    %cst = arith.constant 0.000000e+00 : f32
    %0 = vector.broadcast %cst : f32 to vector<8x1x32xf32>
    %c0 = arith.constant 0 : index
    %c0_0 = arith.constant 0 : index
    %c0_1 = arith.constant 0 : index
    %1 = vector.load %arg8[%c0, %c0_0, %c0_1] : memref<8x18x32xf32, #tpu.memory_space<vmem>>, vector<8x1x32xf32>
    tpu.vector_store %arg8[%c0, %c0_0, %c0_1], %0 {strides = array<i32>} : memref<8x18x32xf32, #tpu.memory_space<vmem>>, vector<8x1x32xf32>,
    %c0_2 = arith.constant 0 : index
    %c17 = arith.constant 17 : index
    %c0_3 = arith.constant 0 : index
    %2 = vector.load %arg8[%c0_2, %c17, %c0_3] : memref<8x18x32xf32, #tpu.memory_space<vmem>>, vector<8x1x32xf32>
    tpu.vector_store %arg8[%c0_2, %c17, %c0_3], %0 {strides = array<i32>} : memref<8x18x32xf32, #tpu.memory_space<vmem>>, vector<8x1x32xf32>,
    %c0_4 = arith.constant 0 : index
    %c0_5 = arith.constant 0 : index
    %c0_6 = arith.constant 0 : index
    %3 = vector.load %arg1[%c0_4, %c0_5, %c0_6] : memref<8x16x32xf32, #tpu.memory_space<vmem>>, vector<8x16x32xf32>
    %c0_7 = arith.constant 0 : index
    %c1 = arith.constant 1 : index
    %c0_8 = arith.constant 0 : index
    %4 = vector.load %arg8[%c0_7, %c1, %c0_8] : memref<8x18x32xf32, #tpu.memory_space<vmem>>, vector<8x16x32xf32>
    tpu.vector_store %arg8[%c0_7, %c1, %c0_8], %3 {strides = array<i32>} : memref<8x18x32xf32, #tpu.memory_space<vmem>>, vector<8x16x32xf32>,
    %cst_9 = arith.constant 0.000000e+00 : f32
    %5 = vector.broadcast %cst_9 : f32 to vector<128x64xf32>
    %c0_10 = arith.constant 0 : index
    %c0_11 = arith.constant 0 : index
    %c0_12 = arith.constant 0 : index
    %6 = vector.load %arg8[%c0_10, %c0_11, %c0_12] : memref<8x18x32xf32, #tpu.memory_space<vmem>>, vector<8x16x32xf32>
    %7 = vector.shape_cast %6 : vector<8x16x32xf32> to vector<128x32xf32>
    %8 = arith.truncf %7 : vector<128x32xf32> to vector<128x32xbf16>
    %c0_13 = arith.constant 0 : index
    %c0_14 = arith.constant 0 : index
    %c0_15 = arith.constant 0 : index
    %9 = vector.load %arg2[%c0_13, %c0_14, %c0_15] : memref<3x32x64xf32, #tpu.memory_space<vmem>>, vector<1x32x64xf32>
    %10 = vector.shape_cast %9 : vector<1x32x64xf32> to vector<32x64xf32>
    %11 = arith.truncf %10 : vector<32x64xf32> to vector<32x64xbf16>
    %cst_16 = arith.constant dense<0.000000e+00> : vector<128x64xf32>
    %12 = tpu.matmul %8, %11, %cst_16 {dimension_numbers = #tpu.dot_dimension_numbers<[1], [0], [0], [1], [0, 0, 1, 1], [], []>} : vector<128x32xbf16>, vector<32x64xbf16>, vector<128x64xf32> -> vector<128x64xf32>
    %13 = arith.addf %5, %12 : vector<128x64xf32>
    %c0_17 = arith.constant 0 : index
    %c1_18 = arith.constant 1 : index
    %c0_19 = arith.constant 0 : index
    %14 = vector.load %arg8[%c0_17, %c1_18, %c0_19] : memref<8x18x32xf32, #tpu.memory_space<vmem>>, vector<8x16x32xf32>
    %15 = vector.shape_cast %14 : vector<8x16x32xf32> to vector<128x32xf32>
    %16 = arith.truncf %15 : vector<128x32xf32> to vector<128x32xbf16>
    %c1_20 = arith.constant 1 : index
    %c0_21 = arith.constant 0 : index
    %c0_22 = arith.constant 0 : index
    %17 = vector.load %arg2[%c1_20, %c0_21, %c0_22] : memref<3x32x64xf32, #tpu.memory_space<vmem>>, vector<1x32x64xf32>
    %18 = vector.shape_cast %17 : vector<1x32x64xf32> to vector<32x64xf32>
    %19 = arith.truncf %18 : vector<32x64xf32> to vector<32x64xbf16>
    %cst_23 = arith.constant dense<0.000000e+00> : vector<128x64xf32>
    %20 = tpu.matmul %16, %19, %cst_23 {dimension_numbers = #tpu.dot_dimension_numbers<[1], [0], [0], [1], [0, 0, 1, 1], [], []>} : vector<128x32xbf16>, vector<32x64xbf16>, vector<128x64xf32> -> vector<128x64xf32>
    %21 = arith.addf %13, %20 : vector<128x64xf32>
    %c0_24 = arith.constant 0 : index
    %c2 = arith.constant 2 : index
    %c0_25 = arith.constant 0 : index
    %22 = vector.load %arg8[%c0_24, %c2, %c0_25] : memref<8x18x32xf32, #tpu.memory_space<vmem>>, vector<8x16x32xf32>
    %23 = vector.shape_cast %22 : vector<8x16x32xf32> to vector<128x32xf32>
    %24 = arith.truncf %23 : vector<128x32xf32> to vector<128x32xbf16>
    %c2_26 = arith.constant 2 : index
    %c0_27 = arith.constant 0 : index
    %c0_28 = arith.constant 0 : index
    %25 = vector.load %arg2[%c2_26, %c0_27, %c0_28] : memref<3x32x64xf32, #tpu.memory_space<vmem>>, vector<1x32x64xf32>
    %26 = vector.shape_cast %25 : vector<1x32x64xf32> to vector<32x64xf32>
    %27 = arith.truncf %26 : vector<32x64xf32> to vector<32x64xbf16>
    %cst_29 = arith.constant dense<0.000000e+00> : vector<128x64xf32>
    %28 = tpu.matmul %24, %27, %cst_29 {dimension_numbers = #tpu.dot_dimension_numbers<[1], [0], [0], [1], [0, 0, 1, 1], [], []>} : vector<128x32xbf16>, vector<32x64xbf16>, vector<128x64xf32> -> vector<128x64xf32>
    %29 = arith.addf %21, %28 : vector<128x64xf32>
    %c0_30 = arith.constant 0 : index
    %c0_31 = arith.constant 0 : index
    %30 = vector.load %arg3[%c0_30, %c0_31] : memref<1x64xf32, #tpu.memory_space<vmem>>, vector<1x64xf32>
    %31 = vector.broadcast %30 : vector<1x64xf32> to vector<128x64xf32>
    %32 = arith.addf %29, %31 : vector<128x64xf32>
    %cst_32 = arith.constant 0.000000e+00 : f32
    %33 = vector.broadcast %cst_32 : f32 to vector<128x64xf32>
    %34 = arith.maximumf %32, %33 : vector<128x64xf32>
    %35 = vector.shape_cast %34 : vector<128x64xf32> to vector<8x16x64xf32>
    %c0_33 = arith.constant 0 : index
    %c0_34 = arith.constant 0 : index
    %36 = vector.load %arg4[%c0_33, %c0_34] : memref<8x32xf32, #tpu.memory_space<vmem>>, vector<8x32xf32>
    %c0_35 = arith.constant 0 : index
    %c0_36 = arith.constant 0 : index
    %37 = vector.load %arg5[%c0_35, %c0_36] : memref<32x64xf32, #tpu.memory_space<vmem>>, vector<32x64xf32>
    %cst_37 = arith.constant dense<0.000000e+00> : vector<8x64xf32>
    %38 = tpu.matmul %36, %37, %cst_37 {dimension_numbers = #tpu.dot_dimension_numbers<[1], [0], [0], [1], [0, 0, 1, 1], [], []>} : vector<8x32xf32>, vector<32x64xf32>, vector<8x64xf32> -> vector<8x64xf32>
    %c0_38 = arith.constant 0 : index
    %c0_39 = arith.constant 0 : index
    %39 = vector.load %arg6[%c0_38, %c0_39] : memref<1x64xf32, #tpu.memory_space<vmem>>, vector<1x64xf32>
    %40 = vector.broadcast %39 : vector<1x64xf32> to vector<8x64xf32>
    %41 = arith.addf %38, %40 : vector<8x64xf32>
    %42 = math.tanh %41 : vector<8x64xf32>
    %43 = vector.shape_cast %42 : vector<8x64xf32> to vector<8x1x64xf32>
    %44 = vector.broadcast %43 : vector<8x1x64xf32> to vector<8x16x64xf32>
    %45 = arith.mulf %35, %44 : vector<8x16x64xf32>
    %cst_40 = arith.constant dense<0.000000e+00> : vector<8x16xf32>
    %46 = vector.multi_reduction <add>, %45, %cst_40 [2] : vector<8x16x64xf32> to vector<8x16xf32>
    %cst_41 = arith.constant dense<0xFF800000> : vector<8xf32>
    %47 = vector.multi_reduction <maximumf>, %46, %cst_41 [1] : vector<8x16xf32> to vector<8xf32>
    %48 = vector.shape_cast %47 : vector<8xf32> to vector<8x1xf32>
    %49 = vector.broadcast %48 : vector<8x1xf32> to vector<8x16xf32>
    %50 = arith.subf %46, %49 : vector<8x16xf32>
    %51 = math.exp %50 : vector<8x16xf32>
    %cst_42 = arith.constant dense<0.000000e+00> : vector<8xf32>
    %52 = vector.multi_reduction <add>, %51, %cst_42 [1] : vector<8x16xf32> to vector<8xf32>
    %53 = vector.shape_cast %52 : vector<8xf32> to vector<8x1xf32>
    %54 = tpu.reciprocal %53 {approx = true} : vector<8x1xf32> -> vector<8x1xf32>
    %55 = vector.broadcast %54 : vector<8x1xf32> to vector<8x16xf32>
    %56 = arith.mulf %51, %55 : vector<8x16xf32>
    %57 = vector.shape_cast %56 : vector<8x16xf32> to vector<8x16x1xf32>
    %58 = vector.broadcast %57 : vector<8x16x1xf32> to vector<8x16x64xf32>
    %59 = arith.mulf %35, %58 : vector<8x16x64xf32>
    %cst_43 = arith.constant dense<0.000000e+00> : vector<8x64xf32>
    %60 = vector.multi_reduction <add>, %59, %cst_43 [1] : vector<8x16x64xf32> to vector<8x64xf32>
    %c0_44 = arith.constant 0 : index
    %c0_45 = arith.constant 0 : index
    %61 = vector.load %arg7[%c0_44, %c0_45] : memref<8x64xf32, #tpu.memory_space<vmem>>, vector<8x64xf32>
    tpu.vector_store %arg7[%c0_44, %c0_45], %60 {strides = array<i32>} : memref<8x64xf32, #tpu.memory_space<vmem>>, vector<8x64xf32>,
    return
  }
  func.func @transform_0(%arg0: i32) -> (i32, i32, i32) {
    %c0_i32 = arith.constant 0 : i32
    %c0_i32_0 = arith.constant 0 : i32
    %c0_i32_1 = arith.constant 0 : i32
    return %arg0, %c0_i32, %c0_i32_0 : i32, i32, i32
  }
  func.func @transform_1(%arg0: i32) -> (i32, i32, i32) {
    %c0_i32 = arith.constant 0 : i32
    %c0_i32_0 = arith.constant 0 : i32
    %c0_i32_1 = arith.constant 0 : i32
    %c0_i32_2 = arith.constant 0 : i32
    return %c0_i32, %c0_i32_0, %c0_i32_1 : i32, i32, i32
  }
  func.func @transform_2(%arg0: i32) -> (i32, i32) {
    %c0_i32 = arith.constant 0 : i32
    %c0_i32_0 = arith.constant 0 : i32
    %c0_i32_1 = arith.constant 0 : i32
    return %c0_i32, %c0_i32_0 : i32, i32
  }
  func.func @transform_3(%arg0: i32) -> (i32, i32) {
    %c0_i32 = arith.constant 0 : i32
    %c0_i32_0 = arith.constant 0 : i32
    return %arg0, %c0_i32 : i32, i32
  }
  func.func @transform_4(%arg0: i32) -> (i32, i32) {
    %c0_i32 = arith.constant 0 : i32
    %c0_i32_0 = arith.constant 0 : i32
    %c0_i32_1 = arith.constant 0 : i32
    return %c0_i32, %c0_i32_0 : i32, i32
  }
  func.func @transform_5(%arg0: i32) -> (i32, i32) {
    %c0_i32 = arith.constant 0 : i32
    %c0_i32_0 = arith.constant 0 : i32
    %c0_i32_1 = arith.constant 0 : i32
    return %c0_i32, %c0_i32_0 : i32, i32
  }
  func.func @transform_6(%arg0: i32) -> (i32, i32) {
    %c0_i32 = arith.constant 0 : i32
    %c0_i32_0 = arith.constant 0 : i32
    return %arg0, %c0_i32 : i32, i32
  }
}

</mosaic_0001>

<bundles_post_ra>
// kernel: npa_cnn_forward.1
= control target key start
LH: loop header
LB: loop body
LE: loop exit
PB: predicated region body
PF: predicated region fallthrough
CT: control target
= control target key end

     0   :  { %s3201_s0 = inlined_call_operand.hbm [shape: f32[16,16,32], index: 0, kind: input, shape index: {}]   ;;  %s3202_s1 = inlined_call_operand.hbm [shape: f32[3,32,64], index: 1, kind: input, shape index: {}]   ;;  %s3203_s2 = inlined_call_operand.vmem [shape: f32[1,64], index: 2, kind: input, shape index: {}]   ;;  %s3204_s3 = inlined_call_operand.hbm [shape: f32[16,32], index: 3, kind: input, shape index: {}]   ;;  %s3205_s4 = inlined_call_operand.hbm [shape: f32[32,64], index: 4, kind: input, shape index: {}]   ;;  %s3206_s5 = inlined_call_operand.vmem [shape: f32[1,64], index: 5, kind: input, shape index: {}]   ;;  %s3207_s6 = inlined_call_operand.hbm [shape: f32[16,64], index: 6, kind: output, shape index: {}]  }
   0x1   :  { %3238 = sst [smem:[#allocation18_spill]] %s3201_s0 }
   0x2   :  { %3239 = sst [smem:[#allocation19_spill]] %s3202_s1 }
   0x3   :  { %11 = vsyncpa [#allocation4], 0 }
   0x4   :  { %13 = vsyncpa [#allocation4 + $0x1], 0 }
   0x5   :  { %14 = vsyncpa [#allocation7], 0 }
   0x6   :  { %15 = vsyncpa [#allocation5], 0 }
   0x7   :  { %17 = vsyncpa [#allocation5 + $0x1], 0  ;;  %s2358_s21 = smov 0   ;;  %s2360_s22 = smov 0  }
   0x8   :  { %s2362_s23 = smov 0   ;;  %s2364_s24 = smov 0  }
   0x9 LB: > { %s2379_s25 = sadd.s32 4294967295, %s2310_s24   ;;  %s1850_s26 = sadd.s32 4294967294, %s2310_s24   ;;  %s2310_s24 = sphi %s2364_s24, %s3281_s24   ;;  %s2306_s23 = sphi %s2362_s23, %s3285_s23   ;;  %s2302_s22 = sphi %s2360_s22, %s3284_s22   ;;  %s2298_s21 = sphi %s2358_s21, %s3283_s21  }
   0xa   : > { %p43_p0 = scmp.ne.s32.totalorder %s2302_s22, %s2298_s21  ;;  %p3214_p1 = scmp.eq.s32.totalorder %s2379_s25, 0 }
   0xb   : > { %p177_p2 = scmp.eq.s32.totalorder %s2379_s25, 1  ;;  %p183_p3 = scmp.eq.s32.totalorder %s1850_s26, 1 }
   0xc   : > { %p2388_p4 = por %p3214_p1, %p43_p0  ;;  %p1851_p5 = scmp.ge.s32.totalorder %s2310_s24, 1 }
   0xd   : > { %p2393_p6 = por %p183_p3, %p43_p0  ;;  %p190_p7 = scmp.lt.s32.totalorder %s2310_s24, 3 }
   0xe   : > { %s3240_s27 = scalar_select %p2388_p4, 1, 0 }
   0xf   : > { %s3241_s28 = scalar_select %p2393_p6, 1, 0 }
  0x10   : > { %p2398_p8 = pnand %p1851_p5, %p190_p7  ;;  %s2312_s30 = smov [#allocation6]  }
  0x11   : > { %s202_s7 = sshll.u32 %s2312_s30, 4  ;;  %s2412_s9 = sadd.s32 1, %s2310_s24   ;;  %s203_s7 = int_to_ptr.vmem [resolvable:$true] %s202_s7 }
  0x12   : > { %s3242_s29 = scalar_select %p2398_p8, 1, 0 }
  0x13   : > { %p2024_p9 = pneg %p2398_p8  ;;  %3244 = sst [smem:[#allocation16_spill]] %s2412_s9 }
  0x14   : > { %s30_s10 = sadd.s32 1, %s2306_s23  ;;  %s27_s11 = ssub.s32 %s2310_s24, %s2412_s9 }
  0x15   : > { %p2407_p11 = pnand %p2024_p9, %p3214_p1  ;;  %s2137_s12 = scalar_lea.vmem %s203_s7, 1536 }
  0x16   : > { %p2138_p13 = scmp.ne.s32.totalorder %s203_s7, %s2137_s12  ;;  %p2145_p5 = scmp.lt.s32.totalorder %s203_s7, %s203_s7 }
  0x17   : > { %p3215_p12 = pneg %p2407_p11  ;;  %p2146_p7 = scmp.lt.s32.totalorder %s2137_s12, %s2137_s12 }
  0x19   : > { %p2140_p0 = pnand %p2138_p13, %p3215_p12  ;;  %p2147_p9 = por %p2146_p7, %p2145_p5 }
  0x1b   : > { %p2141_p3 = pneg %p2140_p0 }
  0x1d   : > { %p2148_p10 = pnand %p2147_p9, %p2141_p3 }
  0x1f   : > { %2151 = shalt.err (!%p2148_p10)
}
  0x20   : > { %s3210_s13 = smov 128   ;;  %s3212_s14 = smov 8  }
  0x21   : > { %s3245_s1 = sld [smem:[#allocation19_spill]]  ;;  %p28_p10 = scmp.eq.s32.totalorder %s27_s11, 0 }
  0x22   : > { %p37_p13 = scmp.ne.s32.totalorder %s2306_s23, %s2302_s22  ;;  %p38_p0 = scmp.eq.s32.totalorder %s2310_s24, 0 }
  0x23   : > { %p2044_p3 = scmp.lt.s32.totalorder %s2310_s24, 2  ;;  %s235_s19 = sand.u32 1, %s2310_s24  }
  0x24   : > { %s2435_s17 = scalar_select %p28_p10, %s2306_s23, %s30_s10  }
  0x25   : > { %p39_p5 = por %p38_p0, %p37_p13  ;;  %p2439_p7 = por %p177_p2, %p37_p13 }
  0x26   : > { %3246 = sst [smem:[#allocation17_spill]] %s2435_s17  ;;  %s237_s20 = sand.u32 1, %s2306_s23  }
  0x27   : > { %2027 = dma.hbm_to_vmem [thread:$0]  (!%p2407_p11), %s3245_s1, 1536, %s203_s7, [#allocation7], %s3210_s13, %s3210_s13, %s3212_s14  }
  0x28   : > { %s3247_s18 = scalar_select %p2439_p7, 1, 0 }
  0x29   : > { %s1855_s26 = sshll.u32 %s237_s20, 7  ;;  %s1899_s30 = sshll.u32 %s2310_s24, 11 }
  0x2a   : > { %s3248_s0 = sld [smem:[#allocation18_spill]]  ;;  %s239_s10 = scalar_lea.vmem [#allocation3], %s1855_s26 }
  0x2b   : > { %s247_s11 = sshll.u32 %s239_s10, 4  ;;  %p2453_p2 = pnand %p2044_p3, %p39_p5  ;;  %s2451_s11 = int_to_ptr.vmem [resolvable:$true] %s247_s11 }
  0x2c   : > { %s2457_s16 = sshll.u32 %s237_s20, 3  ;;  %s2315_s13 = smov [#allocation9]  }
  0x2d   : > { %s2459_s14 = sshll.u32 %s2315_s13, 4  ;;  %s2461_s9 = scalar_lea.sflag [#allocation4], %s235_s19  ;;  %s219_s14 = int_to_ptr.vmem [resolvable:$true] %s2459_s14 }
  0x2e   : > { %p2154_p10 = pneg %p2453_p2 }
  0x30   : > { %s2449_s7 = scalar_lea.hbm %s3248_s0, %s1899_s30  ;;  %s2157_s10 = scalar_lea.hbm %s3248_s0, 4096 }
  0x31   : > { %s2152_s30 = scalar_lea.hbm %s2449_s7, 2048  ;;  %p2158_p3 = scmp.lt.s32.totalorder %s2449_s7, %s3248_s0 }
  0x32   : > { %p2153_p9 = scmp.ne.s32.totalorder %s2449_s7, %s2152_s30  ;;  %p2159_p5 = scmp.lt.s32.totalorder %s2157_s10, %s2152_s30 }
  0x34   : > { %p2155_p13 = pnand %p2154_p10, %p2153_p9  ;;  %p2160_p1 = por %p2159_p5, %p2158_p3 }
  0x36   : > { %p2156_p0 = pneg %p2155_p13 }
  0x38   : > { %p2161_p12 = pnand %p2160_p1, %p2156_p0 }
  0x3a   : > { %2164 = shalt.err (!%p2161_p12)
}
  0x3b   : > { %s2165_s13 = scalar_lea.vmem %s2451_s11, 2048  ;;  %s2316_s19 = smov [#allocation3]  }
  0x3c   : > { %p2166_p6 = scmp.ne.s32.totalorder %s2451_s11, %s2165_s13  ;;  %s2170_s26 = sshll.u32 %s2316_s19, 4  ;;  %s2171_s26 = int_to_ptr.vmem [resolvable:$false] %s2170_s26 }
  0x3d   : > { %s2172_s12 = scalar_lea.vmem %s2171_s26, 4096  ;;  %p2173_p7 = scmp.lt.s32.totalorder %s2451_s11, %s2171_s26 }
  0x3e   : > { %p2168_p9 = pnand %p2166_p6, %p2154_p10  ;;  %p2174_p4 = scmp.lt.s32.totalorder %s2172_s12, %s2165_s13 }
  0x40   : > { %p2169_p13 = pneg %p2168_p9  ;;  %p2175_p8 = por %p2174_p4, %p2173_p7 }
  0x42   : > { %p2176_p3 = pnand %p2175_p8, %p2169_p13 }
  0x44   : > { %2179 = shalt.err (!%p2176_p3)
}
  0x45   : > { %s3250_s1 = smov 8   ;;  %s3251_s30 = smov 128  }
  0x46   : > { %2034 = dma.hbm_to_vmem [thread:$0]  (!%p2453_p2), %s2449_s7, 2048, %s2451_s11, %s2461_s9, %s3251_s30, %s3251_s30, %s3250_s1  }
  0x47   : > { %s2191_s10 = scalar_lea.vmem %s219_s14, 512  ;;  %p3252_p6 = pneg %p2407_p11 }
  0x48   : > { %p2192_p1 = scmp.ne.s32.totalorder %s219_s14, %s2191_s10  ;;  %p2199_p8 = scmp.lt.s32.totalorder %s219_s14, %s219_s14 }
  0x49   : > { %p2200_p7 = scmp.lt.s32.totalorder %s2191_s10, %s2191_s10 }
  0x4a   : > { %p2194_p12 = pnand %p2192_p1, %p3252_p6 }
  0x4b   : > { %p2201_p0 = por %p2200_p7, %p2199_p8 }
  0x4c   : > { %p2195_p4 = pneg %p2194_p12 }
  0x4e   : > { %p2202_p5 = pnand %p2201_p0, %p2195_p4 }
  0x50   : > { %2205 = shalt.err (!%p2202_p5)
}
  0x51   : > { %2030 = dma.hbm_to_vmem [thread:$0]  (!%p2407_p11), %s3205_s4, 512, %s219_s14, [#allocation7], %s3251_s30, %s3251_s30, %s3250_s1  }
  0x52   : > { %s1860_s7 = sshll.u32 %s2310_s24, 7  ;;  %s261_s11 = scalar_lea.vmem [#allocation8], %s2457_s16 }
  0x53   : > { %s268_s19 = sshll.u32 %s261_s11, 4  ;;  %s266_s10 = scalar_lea.hbm %s3204_s3, %s1860_s7  ;;  %s269_s19 = int_to_ptr.vmem [resolvable:$true] %s268_s19 }
  0x54   : > { %s2206_s0 = scalar_lea.hbm %s266_s10, 128  ;;  %s2211_s13 = scalar_lea.hbm %s3204_s3, 256 }
  0x55   : > { %p2207_p9 = scmp.ne.s32.totalorder %s266_s10, %s2206_s0  ;;  %p2212_p11 = scmp.lt.s32.totalorder %s266_s10, %s3204_s3 }
  0x56   : > { %p2213_p1 = scmp.lt.s32.totalorder %s2211_s13, %s2206_s0 }
  0x57   : > { %p2209_p13 = pnand %p2207_p9, %p2154_p10 }
  0x58   : > { %p2214_p6 = por %p2213_p1, %p2212_p11 }
  0x59   : > { %p2210_p3 = pneg %p2209_p13 }
  0x5b   : > { %p2215_p12 = pnand %p2214_p6, %p2210_p3 }
  0x5d   : > { %2218 = shalt.err (!%p2215_p12)
}
  0x5e   : > { %s2219_s16 = scalar_lea.vmem %s269_s19, 128  ;;  %s2317_s1 = smov [#allocation8]  }
  0x5f   : > { %p2220_p4 = scmp.ne.s32.totalorder %s269_s19, %s2219_s16  ;;  %s2224_s30 = sshll.u32 %s2317_s1, 4  ;;  %s2225_s30 = int_to_ptr.vmem [resolvable:$false] %s2224_s30 }
  0x60   : > { %s2226_s7 = scalar_lea.vmem %s2225_s30, 256  ;;  %p2227_p0 = scmp.lt.s32.totalorder %s269_s19, %s2225_s30 }
  0x61   : > { %p2222_p8 = pnand %p2220_p4, %p2154_p10  ;;  %p2228_p5 = scmp.lt.s32.totalorder %s2226_s7, %s2219_s16 }
  0x63   : > { %p2223_p7 = pneg %p2222_p8  ;;  %p2229_p9 = por %p2228_p5, %p2227_p0 }
  0x65   : > { %p2230_p13 = pnand %p2229_p9, %p2223_p7 }
  0x67   : > { %2233 = shalt.err (!%p2230_p13)
}
  0x68   : > { %2037 = dma.hbm_to_vmem [thread:$0]  (!%p2453_p2), %s266_s10, 128, %s269_s19, %s2461_s9  }
  0x69   : > { %p3253_p3 = scmp.ne.s32.totalorder %s3242_s29, 0 }
  0x6a   : > { %s279_s0 = sand.u32 (!%p3253_p3), 1, %s2379_s25   ;;  %s2527_s17 = sand.u32 (!%p3253_p3), 1, %s2302_s22  }
  0x6b   : > { %277 = sbr.rel (%p3253_p3) target bundleno = 1270 (0x4f6), region = 44  ;;  %s1862_s11 = sshll.u32 (!%p3253_p3), %s2527_s17, 7 }
  0x6c   : > { %s280_s26 = scalar_lea.sflag (!%p3253_p3), [#allocation4], %s279_s0  ;;  %s2530_s12 = scalar_lea.vmem (!%p3253_p3), [#allocation3], %s1862_s11 }
  0x6d   : > { %p3254_p10 = scmp.ne.s32.totalorder (!%p3253_p3), %s3240_s27, 0 }
  0x70   : > { %2277 = dma.done.wait (%p3254_p10), %s280_s26, 2048  }
  0x71   : > { %2279 = vsyncadd (%p3254_p10), %s280_s26, 4294965248  ;;  %p3255_p2 = scmp.eq.s32.totalorder %s2379_s25, 0 }
  0x73   : > { %2281 = dma.done.wait (%p3255_p2), [#allocation7], 1536   ;;  %p3256_p11 = pmov %p3255_p2 }
  0x74   : > { %s1864_s29 = sshll.u32 %s2527_s17, 3 }
  0x75   : > { %2283 = vsyncadd (%p3256_p11), [#allocation7], 4294965760  ;;  %s2543_s15 = scalar_lea.vmem [#allocation8], %s1864_s29 }
  0x76   : > { %2285 = dma.done.wait (%p3254_p10), %s280_s26, 128  }
  0x77   : > { %2287 = vsyncadd (%p3254_p10), %s280_s26, 4294967168  ;;  %p3257_p1 = pmov %p3255_p2 }
  0x79   : > { %2289 = dma.done.wait (%p3257_p1), [#allocation7], 512   ;;  %p3258_p6 = pmov %p3257_p1 }
  0x7a   : > { %vm336_vm0 = vcmask 253952   ;;  %v2318_v0 = vmov 0.0   ;;  %vm369_vm1 = vcmask 261120   ;;  %v443_v1 = vld [vmem:[#allocation6 + $0x30] sm:$0xff]  ;;  %v444_v2 = vld [vmem:[#allocation6 + $0x38] sm:$0xff]  ;;  %v441_v3 = vld [vmem:[#allocation6 + $0x20] sm:$0xff] }
  0x7b   : > { %2291 = vsyncadd (%p3258_p6), [#allocation7], 4294966784  ;;  %337 = vst.msk [vmem:[#allocation2] sm:$0x1] %vm336_vm0, %v2318_v0  ;;  %v446_v4 = vpack.c.bf16 %v444_v2, %v443_v1  ;;  %v442_v5 = vld [vmem:[#allocation6 + $0x28] sm:$0xff]  ;;  %v353_v6 = vld [vmem:[%s2530_s12] sm:$0xff] }
  0x7c   : > { %338 = vst.msk [vmem:[#allocation2 + $0x18] sm:$0x1] %vm336_vm0, %v2318_v0  ;;  %339 = vst.msk [vmem:[#allocation2 + $0x30] sm:$0x1] %vm336_vm0, %v2318_v0  ;;  %v354_v7 = vld [vmem:[%s2530_s12 + $0x8] sm:$0xff]  ;;  %v445_v8 = vpack.c.bf16 %v442_v5, %v441_v3  ;;  %v365_v9 = vld [vmem:[%s2530_s12 + $0x60] sm:$0xff] }
  0x7d   : > { %340 = vst.msk [vmem:[#allocation2 + $0x48] sm:$0x1] %vm336_vm0, %v2318_v0  ;;  %341 = vst.msk [vmem:[#allocation2 + $0x60] sm:$0x1] %vm336_vm0, %v2318_v0  ;;  %v366_v10 = vld [vmem:[%s2530_s12 + $0x68] sm:$0xff]  ;;  %v412_v11 = vld [vmem:[#allocation6 + $0x10] sm:$0xff]  ;;  %2006 = vmatprep.subr.bf16.mxu1 %v446_v4  ;;  %1935 = vmatprep.subr.bf16.mxu0 %v446_v4 }
  0x7e   : > { %342 = vst.msk [vmem:[#allocation2 + $0x78] sm:$0x1] %vm336_vm0, %v2318_v0  ;;  %343 = vst.msk [vmem:[#allocation2 + $0x90] sm:$0x1] %vm336_vm0, %v2318_v0  ;;  %v413_v12 = vld [vmem:[#allocation6 + $0x18] sm:$0xff]  ;;  %v355_v13 = vld [vmem:[%s2530_s12 + $0x10] sm:$0xff]  ;;  %2008 = vmatpush3.bf16.msra.mxu1 %v446_v4  ;;  %1936 = vmatpush3.bf16.msra.mxu0 %v446_v4 }
  0x7f   : > { %344 = vst.msk [vmem:[#allocation2 + $0xa8] sm:$0x1] %vm336_vm0, %v2318_v0  ;;  %345 = vst.msk [vmem:[#allocation2 + $0x11] sm:$0x1] %vm336_vm0, %v2318_v0  ;;  %v356_v14 = vld [vmem:[%s2530_s12 + $0x18] sm:$0xff]  ;;  %v367_v15 = vld [vmem:[%s2530_s12 + $0x70] sm:$0xff]  ;;  %2007 = vmatprep.subr.bf16.mxu1 %v445_v8  ;;  %1937 = vmatprep.subr.bf16.mxu0 %v445_v8  ;;  %v415_v17 = vpack.c.bf16 %v413_v12, %v412_v11 }
  0x80   : > { %346 = vst.msk [vmem:[#allocation2 + $0x29] sm:$0x1] %vm336_vm0, %v2318_v0  ;;  %347 = vst.msk [vmem:[#allocation2 + $0x41] sm:$0x1] %vm336_vm0, %v2318_v0  ;;  %v368_v16 = vld [vmem:[%s2530_s12 + $0x78] sm:$0xff]  ;;  %v357_v18 = vld [vmem:[%s2530_s12 + $0x20] sm:$0xff] }
  0x81   : > { %348 = vst.msk [vmem:[#allocation2 + $0x59] sm:$0x1] %vm336_vm0, %v2318_v0  ;;  %349 = vst.msk [vmem:[#allocation2 + $0x71] sm:$0x1] %vm336_vm0, %v2318_v0  ;;  %v358_v19 = vld [vmem:[%s2530_s12 + $0x28] sm:$0xff]  ;;  %v359_v20 = vld [vmem:[%s2530_s12 + $0x30] sm:$0xff] }
  0x82   : > { %350 = vst.msk [vmem:[#allocation2 + $0x89] sm:$0x1] %vm336_vm0, %v2318_v0  ;;  %351 = vst.msk [vmem:[#allocation2 + $0xa1] sm:$0x1] %vm336_vm0, %v2318_v0  ;;  %v360_v21 = vld [vmem:[%s2530_s12 + $0x38] sm:$0xff]  ;;  %v361_v22 = vld [vmem:[%s2530_s12 + $0x40] sm:$0xff]  ;;  %2009 = vmatpush3.bf16.msra.mxu1 %v445_v8  ;;  %1938 = vmatpush3.bf16.msra.mxu0 %v445_v8 }
  0x83   : > { %352 = vst.msk [vmem:[#allocation2 + $0xb9] sm:$0x1] %vm336_vm0, %v2318_v0  ;;  %v362_v23 = vld [vmem:[%s2530_s12 + $0x48] sm:$0xff]  ;;  %v363_v24 = vld [vmem:[%s2530_s12 + $0x50] sm:$0xff]  ;;  %v410_v25 = vld [vmem:[#allocation6] sm:$0xff]  ;;  %1955 = vmatprep.subr.bf16.mxu1 %v415_v17  ;;  %vm2319_vm2 = vmmov 0  }
  0x84   : > { %370 = vst.msk [vmem:[#allocation2 + $0x1] sm:$0xff] %vm369_vm1, %v353_v6  ;;  %371 = vst.msk [vmem:[#allocation2 + $0x9] sm:$0xff] %vm369_vm1, %v354_v7  ;;  %v411_v26 = vld [vmem:[#allocation6 + $0x8] sm:$0xff]  ;;  %v364_v27 = vld [vmem:[%s2530_s12 + $0x58] sm:$0xff]  ;;  %vm1088_vm3 = vcmask 523264   ;;  %vm1164_vm4 = vcmask 130112  }
  0x85   : > { %382 = vst.msk [vmem:[#allocation2 + $0x91] sm:$0xff] %vm369_vm1, %v365_v9  ;;  %383 = vst.msk [vmem:[#allocation2 + $0x99] sm:$0xff] %vm369_vm1, %v366_v10  ;;  %v716_v28 = vld [vmem:[#allocation6 + $0x50] sm:$0xff]  ;;  %v717_v29 = vld [vmem:[#allocation6 + $0x58] sm:$0xff]  ;;  %v414_v45 = vpack.c.bf16 %v411_v26, %v410_v25  ;;  %vm1229_vm5 = vcmask 1041409   ;;  %vm1231_vm6 = vcmask 1042434  }
  0x86   : > { %372 = vst.msk [vmem:[#allocation2 + $0x19] sm:$0xff] %vm369_vm1, %v355_v13  ;;  %373 = vst.msk [vmem:[#allocation2 + $0x21] sm:$0xff] %vm369_vm1, %v356_v14  ;;  %v719_v33 = vpack.c.bf16 %v717_v29, %v716_v28  ;;  %v714_v58 = vld [vmem:[#allocation6 + $0x40] sm:$0xff]  ;;  %v715_v59 = vld [vmem:[#allocation6 + $0x48] sm:$0xff]  ;;  %vm1233_vm7 = vcmask 1043459   ;;  %vm1235_vm8 = vcmask 1044484  }
  0x87   : > { %384 = vst.msk [vmem:[#allocation2 + $0xa9] sm:$0xff] %vm369_vm1, %v367_v15  ;;  %385 = vst.msk [vmem:[#allocation2 + $0xb1] sm:$0xff] %vm369_vm1, %v368_v16  ;;  %v718_v61 = vpack.c.bf16 %v715_v59, %v714_v58  ;;  %v900_v2 = vld [vmem:[#allocation9 + $0x18] sm:$0xff]  ;;  %v899_v6 = vld [vmem:[#allocation9 + $0x10] sm:$0xff]  ;;  %vm1237_vm9 = vcmask 1045509   ;;  %vm1239_vm10 = vcmask 1046534  }
  0x88   : > { %374 = vst.msk [vmem:[#allocation2 + $0x31] sm:$0xff] %vm369_vm1, %v357_v18  ;;  %375 = vst.msk [vmem:[#allocation2 + $0x39] sm:$0xff] %vm369_vm1, %v358_v19  ;;  %1975 = vmatprep.subr.bf16.mxu0 %v719_v33  ;;  %v898_v12 = vld [vmem:[#allocation9 + $0x8] sm:$0xff]  ;;  %v897_v16 = vld [vmem:[#allocation9] sm:$0xff]  ;;  %vm1241_vm11 = vcmask 1047559   ;;  %vm1244_vm12 = vcmask 130048  }
  0x89   : > { %376 = vst.msk [vmem:[#allocation2 + $0x49] sm:$0xff] %vm369_vm1, %v359_v20  ;;  %377 = vst.msk [vmem:[#allocation2 + $0x51] sm:$0xff] %vm369_vm1, %v360_v21  ;;  %s1895_s8 = sshll.u32 %s2379_s25, 7  ;;  %s333_s20 = scalar_lea.vmem [#allocation10], %s1864_s29 }
  0x8a   : > { %378 = vst.msk [vmem:[#allocation2 + $0x61] sm:$0xff] %vm369_vm1, %v361_v22  ;;  %379 = vst.msk [vmem:[#allocation2 + $0x69] sm:$0xff] %vm369_vm1, %v362_v23  ;;  %s1741_s13 = sshll.u32 %s333_s20, 4  ;;  %s3162_s1 = scalar_lea.hbm %s3207_s6, %s1895_s8  ;;  %s1742_s13 = int_to_ptr.vmem [resolvable:$true] %s1741_s13 }
  0x8b   : > { %380 = vst.msk [vmem:[#allocation2 + $0x79] sm:$0xff] %vm369_vm1, %v363_v24  ;;  %v416_v30 = vld [vmem:[#allocation2 + $0x1] sm:$0xff]  ;;  %v417_v31 = vld [vmem:[#allocation2 + $0x9] sm:$0xff]  ;;  %381 = vst.msk [vmem:[#allocation2 + $0x81] sm:$0xff] %vm369_vm1, %v364_v27  ;;  %s1728_s25 = scalar_lea.sflag [#allocation5], %s2527_s17  ;;  %s2234_s30 = scalar_lea.vmem %s1742_s13, 128 }
  0x8c   : > { %v386_v32 = vld [vmem:[#allocation2] sm:$0xff]  ;;  %v432_v34 = vpack.c.bf16 %v417_v31, %v416_v30  ;;  %v428_v35 = vld [vmem:[#allocation2 + $0x91] sm:$0xff]  ;;  %v387_v37 = vld [vmem:[#allocation2 + $0x8] sm:$0xff]  ;;  %p2235_p12 = scmp.ne.s32.totalorder %s1742_s13, %s2234_s30  ;;  %p3278_p4 = scmp.ne.s32.totalorder %s3247_s18, 0 }
  0x8d   : > { %v429_v36 = vld [vmem:[#allocation2 + $0x99] sm:$0xff]  ;;  %v419_v40 = vld [vmem:[#allocation2 + $0x21] sm:$0xff]  ;;  %v402_v48 = vpack.c.bf16 %v387_v37, %v386_v32  ;;  %v690_v9 = vld [vmem:[#allocation2 + $0xa] sm:$0xff]  ;;  %s2322_s7 = smov [#allocation10]  }
  0x8e   : > { %v438_v38 = vpack.c.bf16 %v429_v36, %v428_v35  ;;  %v418_v39 = vld [vmem:[#allocation2 + $0x19] sm:$0xff]  ;;  %1939 = vmatprep.mubr.msk.bf16.mxu0 %vm369_vm1, %v432_v34  ;;  %v430_v42 = vld [vmem:[#allocation2 + $0xa9] sm:$0xff]  ;;  %v431_v43 = vld [vmem:[#allocation2 + $0xb1] sm:$0xff]  ;;  %p2236_p8 = pnand %p2235_p12, %p3278_p4  ;;  %s2238_s0 = sshll.u32 %s2322_s7, 4  ;;  %s2239_s0 = int_to_ptr.vmem [resolvable:$false] %s2238_s0 }
  0x8f   : > { %v433_v41 = vpack.c.bf16 %v419_v40, %v418_v39  ;;  %v439_v44 = vpack.c.bf16 %v431_v43, %v430_v42  ;;  %v420_v46 = vld [vmem:[#allocation2 + $0x31] sm:$0xff]  ;;  %v421_v47 = vld [vmem:[#allocation2 + $0x39] sm:$0xff]  ;;  %v689_v8 = vld [vmem:[#allocation2 + $0x2] sm:$0xff]  ;;  %s2240_s11 = scalar_lea.vmem %s2239_s0, 256  ;;  %p2241_p0 = scmp.lt.s32.totalorder %s1742_s13, %s2239_s0 }
  0x90   : > { %1951 = vmatprep.mubr.msk.bf16.mxu1 %vm369_vm1, %v438_v38  ;;  %v434_v49 = vpack.c.bf16 %v421_v47, %v420_v46  ;;  %v388_v50 = vld [vmem:[#allocation2 + $0x18] sm:$0xff]  ;;  %v422_v51 = vld [vmem:[#allocation2 + $0x49] sm:$0xff]  ;;  %v389_v53 = vld [vmem:[#allocation2 + $0x20] sm:$0xff]  ;;  %v705_v15 = vpack.c.bf16 %v690_v9, %v689_v8  ;;  %p2237_p7 = pneg %p2236_p8  ;;  %p2242_p5 = scmp.lt.s32.totalorder %s2240_s11, %s2234_s30 }
  0x91   : > { %1940 = vmatmul.mubr.msk.bf16.vlgmr.msra.gmra.mxu0 %vm369_vm1, %v433_v41  ;;  %1952 = vmatmul.mubr.msk.bf16.vlgmr.msra.gmra.mxu1 %vm369_vm1, %v439_v44  ;;  %v423_v52 = vld [vmem:[#allocation2 + $0x51] sm:$0xff]  ;;  %v424_v54 = vld [vmem:[#allocation2 + $0x61] sm:$0xff]  ;;  %v425_v55 = vld [vmem:[#allocation2 + $0x69] sm:$0xff]  ;;  %v403_v62 = vpack.c.bf16 %v389_v53, %v388_v50 }
  0x92   : > { %1976 = vmatpush3.bf16.msra.mxu0 %v719_v33  ;;  %1956 = vmatpush3.bf16.msra.mxu1 %v415_v17  ;;  %v390_v56 = vld [vmem:[#allocation2 + $0x30] sm:$0xff]  ;;  %v391_v57 = vld [vmem:[#allocation2 + $0x38] sm:$0xff]  ;;  %v435_v60 = vpack.c.bf16 %v423_v52, %v422_v51  ;;  %v436_v63 = vpack.c.bf16 %v425_v55, %v424_v54  ;;  %v427_v4 = vld [vmem:[#allocation2 + $0x81] sm:$0xff]  ;;  %p2243_p9 = por %p2242_p5, %p2241_p0 }
  0x93   : > { %1943 = vmatprep.mubr.msk.bf16.mxu0 %vm369_vm1, %v434_v49  ;;  %1957 = vmatprep.subr.bf16.mxu1 %v414_v45  ;;  %v404_v1 = vpack.c.bf16 %v391_v57, %v390_v56  ;;  %v426_v3 = vld [vmem:[#allocation2 + $0x79] sm:$0xff]  ;;  %v392_v5 = vld [vmem:[#allocation2 + $0x48] sm:$0xff]  ;;  %v393_v7 = vld [vmem:[#allocation2 + $0x50] sm:$0xff] }
  0x94   : > { %1959 = vmatprep.mubr.msk.bf16.mxu1 %vm369_vm1, %v402_v48  ;;  %1977 = vmatprep.subr.bf16.mxu0 %v718_v61  ;;  %v394_v10 = vld [vmem:[#allocation2 + $0x60] sm:$0xff]  ;;  %v395_v11 = vld [vmem:[#allocation2 + $0x68] sm:$0xff]  ;;  %v437_v13 = vpack.c.bf16 %v427_v4, %v426_v3  ;;  %v405_v14 = vpack.c.bf16 %v393_v7, %v392_v5  ;;  %v396_v18 = vld [vmem:[#allocation2 + $0x78] sm:$0xff]  ;;  %p2244_p13 = pnand %p2243_p9, %p2237_p7 }
  0x95   : > { %v406_v17 = vpack.c.bf16 %v395_v11, %v394_v10  ;;  %v691_v19 = vld [vmem:[#allocation2 + $0x1a] sm:$0xff]  ;;  %v692_v20 = vld [vmem:[#allocation2 + $0x22] sm:$0xff]  ;;  %v693_v22 = vld [vmem:[#allocation2 + $0x32] sm:$0xff] }
  0x96   : > { %1958 = vmatpush3.bf16.msra.mxu1 %v414_v45  ;;  %1978 = vmatpush3.bf16.msra.mxu0 %v718_v61  ;;  %v397_v21 = vld [vmem:[#allocation2 + $0x80] sm:$0xff]  ;;  %v398_v24 = vld [vmem:[#allocation2 + $0x90] sm:$0xff]  ;;  %v399_v25 = vld [vmem:[#allocation2 + $0x98] sm:$0xff]  ;;  %v706_v26 = vpack.c.bf16 %v692_v20, %v691_v19 }
  0x97   : > { %1995 = vmatprep.subr.mxu1 %v2318_v0  ;;  %v694_v23 = vld [vmem:[#allocation2 + $0x3a] sm:$0xff]  ;;  %v407_v27 = vpack.c.bf16 %v397_v21, %v396_v18  ;;  %v408_v29 = vpack.c.bf16 %v399_v25, %v398_v24  ;;  %v400_v30 = vld [vmem:[#allocation2 + $0xa8] sm:$0xff]  ;;  %v696_v32 = vld [vmem:[#allocation2 + $0x52] sm:$0xff] }
  0x98   : > { %v707_v28 = vpack.c.bf16 %v694_v23, %v693_v22  ;;  %v695_v31 = vld [vmem:[#allocation2 + $0x4a] sm:$0xff]  ;;  %v697_v34 = vld [vmem:[#allocation2 + $0x62] sm:$0xff]  ;;  %v699_v39 = vld [vmem:[#allocation2 + $0x7a] sm:$0xff] }
  0x99   : > { %1944 = vmatmul.mubr.msk.bf16.gmra.mxu0 %vm369_vm1, %v435_v60  ;;  %1960 = vmatmul.mubr.msk.bf16.vlgmr.msra.gmra.mxu1 %vm369_vm1, %v403_v62  ;;  %v401_v33 = vld [vmem:[#allocation2 + $0xb0] sm:$0xff]  ;;  %v708_v36 = vpack.c.bf16 %v696_v32, %v695_v31  ;;  %v700_v40 = vld [vmem:[#allocation2 + $0x82] sm:$0xff]  ;;  %v702_v42 = vld [vmem:[#allocation2 + $0x9a] sm:$0xff]  ;;  %v987_v32 = vlaneseq }
  0x9a   : > { %1947 = vmatprep.mubr.msk.bf16.mxu0 %vm369_vm1, %v436_v63  ;;  %1996 = vmatpush3.msra.mxu1 %v900_v2  ;;  %v698_v35 = vld [vmem:[#allocation2 + $0x6a] sm:$0xff]  ;;  %v409_v37 = vpack.c.bf16 %v401_v33, %v400_v30  ;;  %v701_v41 = vld [vmem:[#allocation2 + $0x92] sm:$0xff]  ;;  %v710_v43 = vpack.c.bf16 %v700_v40, %v699_v39  ;;  %v1892_v24 = vld [vmem:[%s3206_s5] ss:$0 sm:$0xff]  ;;  %v2320_v30 = vmov 1966171168  }
  0x9b   : > { %1963 = vmatprep.mubr.msk.bf16.mxu1 %vm369_vm1, %v404_v1  ;;  %1997 = vmatprep.subr.mxu1 %v2318_v0  ;;  %v709_v38 = vpack.c.bf16 %v698_v35, %v697_v34  ;;  %v711_v44 = vpack.c.bf16 %v702_v42, %v701_v41  ;;  %v896_v45 = vld [vmem:[%s2543_s15] sm:$0xff]  ;;  %v704_v47 = vld [vmem:[#allocation2 + $0xb2] sm:$0xff]  ;;  %v985_v31 = vunpack.c.l.s4 %v2320_v30  ;;  %v2692_v35 = vshrl.u32 %v987_v32, 7 }
  0x9c   : > { %1998 = vmatpush3.msra.mxu1 %v899_v6  ;;  %v703_v46 = vld [vmem:[#allocation2 + $0xaa] sm:$0xff] }
  0x9d   : > { %1999 = vmatprep.subr.mxu1 %v2318_v0  ;;  %v712_v48 = vpack.c.bf16 %v704_v47, %v703_v46  ;;  %v986_v34 = vunpack.c.0.s8 %v985_v31 }
  0x9e   : > { %2000 = vmatpush3.msra.mxu1 %v898_v12 }
  0x9f   : > { %2001 = vmatprep.subr.mxu1 %v2318_v0  ;;  %v2697_v41 = vsub.s32 %v986_v34, %v2692_v35 }
  0xa0   : > { %2002 = vmatpush3.msra.mxu1 %v897_v16 }
  0xa1   : > { %1948 = vmatmul.mubr.msk.bf16.gmra.mxu0 %vm369_vm1, %v437_v13  ;;  %1964 = vmatmul.mubr.msk.bf16.gmra.mxu1 %vm369_vm1, %v405_v14 }
  0xa2   : > { %1979 = vmatprep.mubr.msk.bf16.mxu0 %vm369_vm1, %v705_v15  ;;  %1967 = vmatprep.mubr.msk.bf16.mxu1 %vm369_vm1, %v406_v17 }
  0xa9   : > { %1980 = vmatmul.mubr.msk.bf16.vlgmr.msra.gmra.mxu0 %vm369_vm1, %v706_v26  ;;  %1968 = vmatmul.mubr.msk.bf16.gmra.mxu1 %vm369_vm1, %v407_v27 }
  0xaa   : > { %1983 = vmatprep.mubr.msk.bf16.mxu0 %vm369_vm1, %v707_v28  ;;  %1971 = vmatprep.mubr.msk.bf16.mxu1 %vm369_vm1, %v408_v29 }
  0xb1   : > { %1984 = vmatmul.mubr.msk.bf16.gmra.mxu0 %vm369_vm1, %v708_v36  ;;  %1972 = vmatmul.mubr.msk.bf16.gmra.mxu1 %vm369_vm1, %v409_v37 }
  0xb2   : > { %1987 = vmatprep.mubr.msk.bf16.mxu0 %vm369_vm1, %v709_v38  ;;  %2003 = vmatprep.mubr.msk.f32.mxu1 %vm2319_vm2, %v2318_v0 }
  0xb9   : > { %1988 = vmatmul.mubr.msk.bf16.gmra.mxu0 %vm369_vm1, %v710_v43  ;;  %2004 = vmatmul.mubr.msk.f32.vlgmr.msra.gmra.mxu1 %vm369_vm1, %v896_v45  ;;  %v2702_v45 = vld [vmem:[%s3203_s2] ss:$0 sm:$0xff] }
  0xba   : > { %1991 = vmatprep.mubr.msk.bf16.mxu0 %vm369_vm1, %v711_v44 }
  0xc1   : > { %1992 = vmatmul.mubr.msk.bf16.gmra.mxu0 %vm369_vm1, %v712_v48  ;;  %v2705_v48 = vsub.s32 0, %v2692_v35 }
 0x151   : > { %v1941_v49 = vpop.f32.mrf.mxu0  ;;  %v2648_v50 = vpop.f32.mrf.mxu1 }
 0x153   : > { %v505_v0 = vpop.f32.mrf.mxu0  ;;  %v2650_v51 = vpop.f32.mrf.mxu1 }
 0x155   : > { %v1942_v52 = vpop.f32.mrf.mxu0  ;;  %v2652_v53 = vpop.f32.mrf.mxu1 }
 0x157   : > { %v508_v54 = vpop.f32.mrf.mxu0  ;;  %v2654_v55 = vpop.f32.mrf.mxu1 }
 0x159   : > { %v2656_v56 = vpop.f32.mrf.mxu0  ;;  %v1961_v57 = vpop.f32.mrf.mxu1 }
 0x15a   : > { %v635_v37 = vadd.f32 %v1961_v57, %v1941_v49 }
 0x15b   : > { %v521_v58 = vpop.f32.mrf.mxu0  ;;  %v626_v59 = vpop.f32.mrf.mxu1 }
 0x15c   : > { %v627_v36 = vadd.f32 %v626_v59, %v505_v0 }
 0x15d   : > { %v2658_v60 = vpop.f32.mrf.mxu0  ;;  %v1962_v61 = vpop.f32.mrf.mxu1 }
 0x15e   : > { %v638_v42 = vadd.f32 %v1962_v61, %v1942_v52 }
 0x15f   : > { %v524_v62 = vpop.f32.mrf.mxu0  ;;  %v629_v63 = vpop.f32.mrf.mxu1 }
 0x160   : > { %v630_v38 = vadd.f32 %v629_v63, %v508_v54 }
 0x161   : > { %v2660_v1 = vpop.f32.mrf.mxu0  ;;  %v2662_v2 = vpop.f32.mrf.mxu1 }
 0x163   : > { %v537_v3 = vpop.f32.mrf.mxu0  ;;  %v642_v4 = vpop.f32.mrf.mxu1 }
 0x164   : > { %v643_v49 = vadd.f32 %v642_v4, %v521_v58 }
 0x165   : > { %v2664_v5 = vpop.f32.mrf.mxu0  ;;  %v2666_v6 = vpop.f32.mrf.mxu1 }
 0x167   : > { %v2668_v7 = vpop.f32.mrf.mxu0  ;;  %v645_v8 = vpop.f32.mrf.mxu1 }
 0x168   : > { %v646_v59 = vadd.f32 %v645_v8, %v524_v62 }
 0x169   : > { %v1981_v9 = vpop.f32.mrf.mxu0  ;;  %v2670_v10 = vpop.f32.mrf.mxu1 }
 0x16a   : > { %v843_v43 = vadd.f32 %v1981_v9, %v635_v37 }
 0x16b   : > { %v778_v11 = vpop.f32.mrf.mxu0  ;;  %v658_v12 = vpop.f32.mrf.mxu1 }
 0x16c   : > { %v841_v39 = vadd.f32 %v778_v11, %v627_v36  ;;  %v2712_v61 = vadd.f32 %v2702_v45, %v843_v43  ;;  %v659_v58 = vadd.f32 %v658_v12, %v537_v3  ;;  %v654_v43 = vadd.f32 %v2666_v6, %v2658_v60 }
 0x16d   : > { %v1982_v13 = vpop.f32.mrf.mxu0  ;;  %v2672_v14 = vpop.f32.mrf.mxu1 }
 0x16e   : > { %v844_v47 = vadd.f32 %v1982_v13, %v638_v42  ;;  %v2708_v0 = vadd.f32 %v2702_v45, %v841_v39  ;;  %v3231_v3 = vmax.f32 %v2712_v61, 0.0 }
 0x16f   : > { %v781_v15 = vpop.f32.mrf.mxu0  ;;  %v661_v16 = vpop.f32.mrf.mxu1 }
 0x170   : > { %v842_v44 = vadd.f32 %v781_v15, %v630_v38  ;;  %v2719_v4 = vadd.f32 %v2702_v45, %v844_v47  ;;  %v3228_v62 = vmax.f32 %v2708_v0, 0.0  ;;  %v662_v12 = vadd.f32 %v661_v16, %v2668_v7 }
 0x171   : > { %v2674_v17 = vpop.f32.mrf.mxu0  ;;  %v2676_v18 = vpop.f32.mrf.mxu1 }
 0x172   : > { %v2715_v63 = vadd.f32 %v2702_v45, %v842_v44  ;;  %v3234_v37 = vmax.f32 %v2719_v4, 0.0  ;;  %v667_v44 = vadd.f32 %v2670_v10, %v2660_v1 }
 0x173   : > { %v794_v19 = vpop.f32.mrf.mxu0  ;;  %v2678_v20 = vpop.f32.mrf.mxu1 }
 0x174   : > { %v845_v9 = vadd.f32 %v794_v19, %v643_v49 }
 0x175   : > { %v2680_v21 = vpop.f32.mrf.mxu1  ;;  %v2682_v22 = vpop.f32.mrf.mxu0 }
 0x176   : > { %v2733_v30 = vadd.f32 %v2702_v45, %v845_v9 }
 0x177   : > { %v2684_v23 = vpop.f32.mrf.mxu1  ;;  %v797_v26 = vpop.f32.mrf.mxu0 }
 0x178   : > { %v846_v15 = vadd.f32 %v797_v26, %v646_v59  ;;  %v3232_v26 = vmax.f32 %v2715_v63, 0.0  ;;  %v3229_v47 = vmax.f32 %v2733_v30, 0.0 }
 0x179   : > { %v977_v25 = vpop.f32.mrf.mxu1  ;;  %v2689_v29 = vpop.f32.mrf.mxu0 }
 0x17a   : > { %v978_v27 = vadd.f32 %v1892_v24, %v977_v25  ;;  %v2740_v38 = vadd.f32 %v2702_v45, %v846_v15 }
 0x17b   : > { %v2005_v28 = vpop.f32.mrf.mxu1  ;;  %v810_v33 = vpop.f32.mrf.mxu0 }
 0x17c   : > { %2090 = vtanh.f32 %v978_v27  ;;  %v651_v28 = vadd.f32 %v2662_v2, %v2656_v56  ;;  %v849_v31 = vadd.f32 %v810_v33, %v659_v58  ;;  %v3233_v60 = vmax.f32 %v2740_v38, 0.0 }
 0x17d   : > { %v2694_v40 = vpop.f32.mrf.mxu0 }
 0x17e   : > { %v2758_v49 = vadd.f32 %v2702_v45, %v849_v31 }
 0x17f   : > { %v813_v54 = vpop.f32.mrf.mxu0 }
 0x180   : > { %v850_v56 = vadd.f32 %v813_v54, %v662_v12  ;;  %v3225_v15 = vmax.f32 %v2758_v49, 0.0 }
 0x181   : > { %v2723_v8 = vpop.f32.mrf.mxu0 }
 0x182   : > { %v2766_v6 = vadd.f32 %v2702_v45, %v850_v56 }
 0x183   : > { %v826_v7 = vpop.f32.mrf.mxu0 }
 0x185   : > { %v1994_v10 = vpop.f32.mrf.mxu0 }
 0x189   : > { %v2091_v46 = vpop.eup %2090 }
 0x18a   : > { %v990_v57 = vrot.slane %v2091_v46, %v2697_v41  ;;  %v983_v52 = vcombine.high %v2091_v46, %v2091_v46  ;;  %v847_v46 = vadd.f32 %v2674_v17, %v651_v28 }
 0x18c   : > { %v1006_v11 = vrot.slane %v990_v57, %v2697_v41  ;;  %v998_v13 = vcombine.high %v990_v57, %v990_v57  ;;  %v997_v24 = vrot.slane %v983_v52, %v2697_v41  ;;  %v848_v52 = vadd.f32 %v2682_v22, %v654_v43 }
 0x18d   : > { %v670_v22 = vadd.f32 %v2672_v14, %v2664_v5  ;;  %v2777_v58 = vadd.f32 %v2702_v45, %v847_v46  ;;  %v3226_v14 = vmax.f32 %v2766_v6, 0.0 }
 0x18e   : > { %v1035_v25 = vrot.slane %v1006_v11, %v2705_v48  ;;  %v1020_v27 = vrot.slane %v998_v13, %v2697_v41  ;;  %v1028_v19 = vcombine.high %v1006_v11, %v1006_v11  ;;  %v2743_v2 = vrot.slane %v997_v24, %v2697_v41 }
 0x18f   : > { %v999_v1 = vcombine.high %v997_v24, %v997_v24  ;;  %v851_v13 = vadd.f32 %v2689_v29, %v667_v44  ;;  %v852_v5 = vadd.f32 %v2694_v40, %v670_v22  ;;  %v829_v29 = vpop.f32.mrf.mxu0  ;;  %v3227_v40 = vmax.f32 %v2777_v58, 0.0 }
 0x190   : > { %v1072_v34 = vmul.f32 %v1035_v25, %v3228_v62  ;;  %v1039_v36 = vrot.slane %v1020_v27, %v2705_v48  ;;  %v1073_v39 = vmul.f32 %v1035_v25, %v3232_v26  ;;  %v1043_v42 = vrot.slane %v1028_v19, %v2705_v48 }
 0x191   : > { %v1051_v9 = vrot.slane %v2743_v2, %v2705_v48  ;;  %v1030_v11 = vcombine.high %v1020_v27, %v1020_v27  ;;  %v675_v19 = vadd.f32 %v2678_v20, %v2650_v51  ;;  %v2786_v27 = vadd.f32 %v2702_v45, %v848_v52 }
 0x192   : > { %v1089_v16 = vsel %vm1088_vm3, %v1072_v34, 0.0  ;;  %v1074_v33 = vmul.f32 %v1039_v36, %v3231_v3  ;;  %v1075_v57 = vmul.f32 %v1039_v36, %v3234_v37  ;;  %v1092_v17 = vsel %vm1088_vm3, %v1073_v39, 0.0 }
 0x193   : > { %1090 = vadd.xlane.f32.xlu0 %v1089_v16  ;;  %v1076_v59 = vmul.f32 %v1043_v42, %v3229_v47  ;;  %v1077_v25 = vmul.f32 %v1043_v42, %v3233_v60  ;;  %v1080_v12 = vmul.f32 %v1051_v9, %v3225_v15  ;;  %v1047_v31 = vrot.slane %v1030_v11, %v2705_v48 }
 0x194   : > { %v1095_v54 = vsel %vm1088_vm3, %v1074_v33, 0.0  ;;  %v1098_v24 = vsel %vm1088_vm3, %v1075_v57, 0.0  ;;  %v1027_v34 = vrot.slane %v999_v1, %v2697_v41  ;;  %v678_v51 = vadd.f32 %v2684_v23, %v2654_v55 }
 0x195   : > { %1096 = vadd.xlane.f32.xlu1 %v1095_v54  ;;  %v1101_v28 = vsel %vm1088_vm3, %v1076_v59, 0.0  ;;  %v2798_v20 = vadd.f32 %v2702_v45, %v851_v13  ;;  %v853_v36 = vadd.f32 %v826_v7, %v675_v19  ;;  %v1104_v56 = vsel %vm1088_vm3, %v1077_v25, 0.0 }
 0x196   : > { %v1081_v16 = vmul.f32 %v1051_v9, %v3226_v14  ;;  %v683_v33 = vadd.f32 %v2676_v18, %v2648_v50  ;;  %v3230_v41 = vmax.f32 %v2786_v27, 0.0  ;;  %v2808_v39 = vadd.f32 %v2702_v45, %v852_v5 }
 0x197   : > { %1093 = vadd.xlane.f32.xlu0 %v1092_v17  ;;  %v854_v55 = vadd.f32 %v829_v29, %v678_v51  ;;  %v1113_v23 = vsel %vm1088_vm3, %v1080_v12, 0.0  ;;  %v1078_v7 = vmul.f32 %v1047_v31, %v3227_v40  ;;  %v1055_v42 = vrot.slane %v1027_v34, %v2705_v48 }
 0x198   : > { %v1029_v43 = vcombine.high %v2743_v2, %v2743_v2  ;;  %v686_v50 = vadd.f32 %v2680_v21, %v2652_v53  ;;  %v3224_v18 = vmax.f32 %v2798_v20, 0.0  ;;  %v855_v44 = vadd.f32 %v2723_v8, %v683_v33 }
 0x199   : > { %1099 = vadd.xlane.f32.xlu1 %v1098_v24  ;;  %v2821_v46 = vadd.f32 %v2702_v45, %v853_v36  ;;  %v1116_v54 = vsel %vm1088_vm3, %v1081_v16, 0.0  ;;  %v1079_v57 = vmul.f32 %v1047_v31, %v3230_v41  ;;  %v3223_v52 = vmax.f32 %v2808_v39, 0.0 }
 0x19a   : > { %v856_v1 = vadd.f32 %v1994_v10, %v686_v50  ;;  %v2828_v2 = vadd.f32 %v2702_v45, %v854_v55  ;;  %v1107_v53 = vsel %vm1088_vm3, %v1078_v7, 0.0  ;;  %v1082_v21 = vmul.f32 %v1055_v42, %v3224_v18 }
 0x19b   : > { %1102 = vadd.xlane.f32.xlu0 %v1101_v28  ;;  %v1059_v8 = vrot.slane %v1029_v43, %v2705_v48  ;;  %v1031_v17 = vcombine.high %v1027_v34, %v1027_v34  ;;  %v2835_v59 = vadd.f32 %v2702_v45, %v855_v44  ;;  %v3222_v9 = vmax.f32 %v2821_v46, 0.0 }
 0x19c   : > { %v1110_v10 = vsel %vm1088_vm3, %v1079_v57, 0.0  ;;  %v1083_v11 = vmul.f32 %v1055_v42, %v3223_v52  ;;  %v2842_v22 = vadd.f32 %v2702_v45, %v856_v1  ;;  %v3221_v13 = vmax.f32 %v2828_v2, 0.0 }
 0x19d   : > { %1105 = vadd.xlane.f32.xlu1 %v1104_v56  ;;  %v1119_v24 = vsel %vm1088_vm3, %v1082_v21, 0.0  ;;  %v1084_v25 = vmul.f32 %v1059_v8, %v3222_v9  ;;  %v1063_v19 = vrot.slane %v1031_v17, %v2705_v48  ;;  %v3220_v5 = vmax.f32 %v2835_v59, 0.0 }
 0x19e   : > { %v1122_v29 = vsel %vm1088_vm3, %v1083_v11, 0.0  ;;  %v1085_v28 = vmul.f32 %v1059_v8, %v3221_v13  ;;  %v3219_v45 = vmax.f32 %v2842_v22, 0.0  ;;  %v1154_v43 = vand.u32 127, %v987_v32 }
 0x19f   : > { %1114 = vadd.xlane.f32.xlu0 %v1113_v23  ;;  %v1125_v12 = vsel %vm1088_vm3, %v1084_v25, 0.0  ;;  %v1086_v31 = vmul.f32 %v1063_v19, %v3220_v5  ;;  %v3237_v9 = vsub.s32 3, %v2692_v35 }
 0x1a0   : > { %v1128_v34 = vsel %vm1088_vm3, %v1085_v28, 0.0  ;;  %v1087_v51 = vmul.f32 %v1063_v19, %v3219_v45  ;;  %v1159_v44 = vadd.s32 4294967288, %v1154_v43  ;;  %v2887_v21 = vsub.s32 %v1154_v43, %v2692_v35 }
 0x1a1   : > { %1117 = vadd.xlane.f32.xlu1 %v1116_v54  ;;  %v1131_v36 = vsel %vm1088_vm3, %v1086_v31, 0.0 }
 0x1a2   : > { %v1134_v56 = vsel %vm1088_vm3, %v1087_v51, 0.0  ;;  %v2882_v1 = vsub.s32 %v1159_v44, %v2692_v35 }
 0x1a3   : > { %1108 = vadd.xlane.f32.xlu0 %v1107_v53 }
 0x1a5   : > { %1111 = vadd.xlane.f32.xlu1 %v1110_v10 }
 0x1a7   : > { %1120 = vadd.xlane.f32.xlu0 %v1119_v24 }
 0x1a9   : > { %1123 = vadd.xlane.f32.xlu1 %v1122_v29 }
 0x1ab   : > { %1126 = vadd.xlane.f32.xlu0 %v1125_v12 }
 0x1ad   : > { %1129 = vadd.xlane.f32.xlu1 %v1128_v34 }
 0x1af   : > { %1132 = vadd.xlane.f32.xlu0 %v1131_v36 }
 0x1b1   : > { %1135 = vadd.xlane.f32.xlu1 %v1134_v56 }
 0x21c   : > { %v2862_v16 = vpop.xlane.xlu0 %1090 }
 0x21d   : > { %v1158_v29 = vrot.slane %v2862_v16, %v2887_v21 }
 0x21e   : > { %v2864_v33 = vpop.xlane.xlu1 %1096 }
 0x21f   : > { %v1169_v10 = vrot.slane %v2864_v33, %v2887_v21 }
 0x220   : > { %v2866_v55 = vpop.xlane.xlu0 %1093 }
 0x221   : > { %v1163_v11 = vrot.slane %v2866_v55, %v2882_v1 }
 0x222   : > { %v2868_v23 = vpop.xlane.xlu1 %1099 }
 0x223   : > { %v1173_v8 = vrot.slane %v2868_v23, %v2882_v1  ;;  %v1165_v51 = vsel %vm1164_vm4, %v1163_v11, %v1158_v29 }
 0x224   : > { %v2870_v7 = vpop.xlane.xlu0 %1102 }
 0x225   : > { %v1178_v25 = vrot.slane %v2870_v7, %v2887_v21  ;;  %v1174_v28 = vsel %vm1164_vm4, %v1173_v8, %v1169_v10 }
 0x226   : > { %v2872_v42 = vpop.xlane.xlu1 %1105  ;;  %v1230_v43 = vsel %vm1229_vm5, %v1174_v28, %v1165_v51 }
 0x227   : > { %v1182_v32 = vrot.slane %v2872_v42, %v2882_v1 }
 0x228   : > { %v2875_v50 = vpop.xlane.xlu0 %1114 }
 0x229   : > { %v1183_v31 = vsel %vm1164_vm4, %v1182_v32, %v1178_v25 }
 0x22a   : > { %v2877_v54 = vpop.xlane.xlu1 %1117  ;;  %v1232_v10 = vsel %vm1231_vm6, %v1183_v31, %v1230_v43 }
 0x22b   : > { %v1200_v44 = vrot.slane %v2877_v54, %v2882_v1 }
 0x22c   : > { %v2879_v57 = vpop.xlane.xlu0 %1108 }
 0x22d   : > { %v1187_v12 = vrot.slane %v2879_v57, %v2887_v21 }
 0x22e   : > { %v2884_v53 = vpop.xlane.xlu1 %1111 }
 0x22f   : > { %v1191_v24 = vrot.slane %v2884_v53, %v2882_v1 }
 0x230   : > { %v2893_v17 = vpop.xlane.xlu0 %1120 }
 0x231   : > { %v1192_v36 = vsel %vm1164_vm4, %v1191_v24, %v1187_v12  ;;  %v1205_v32 = vrot.slane %v2893_v17, %v2887_v21  ;;  %v1196_v24 = vrot.slane %v2875_v50, %v2887_v21 }
 0x232   : > { %v2903_v19 = vpop.xlane.xlu1 %1123  ;;  %v1234_v25 = vsel %vm1233_vm7, %v1192_v36, %v1232_v10 }
 0x233   : > { %v1209_v56 = vrot.slane %v2903_v19, %v2882_v1  ;;  %v1201_v31 = vsel %vm1164_vm4, %v1200_v44, %v1196_v24  ;;  %v2321_v24 = vmov 0  }
 0x234   : > { %v2911_v34 = vpop.xlane.xlu0 %1126  ;;  %v1236_v10 = vsel %vm1235_vm8, %v1201_v31, %v1234_v25  ;;  %2089 = vset.pattern.permute.xlu0 %v2321_v24  ;;  %2088 = vset.pattern.permute.xlu1 %v2321_v24 }
 0x235   : > { %v1214_v29 = vrot.slane %v2911_v34, %v2887_v21  ;;  %v1210_v12 = vsel %vm1164_vm4, %v1209_v56, %v1205_v32 }
 0x236   : > { %v2920_v8 = vpop.xlane.xlu1 %1129  ;;  %v1238_v5 = vsel %vm1237_vm9, %v1210_v12, %v1236_v10  ;;  %v3235_v10 = vsub.s32 6, %v2692_v35 }
 0x237   : > { %v1218_v11 = vrot.slane %v2920_v8, %v2882_v1 }
 0x238   : > { %v2932_v28 = vpop.xlane.xlu0 %1132 }
 0x239   : > { %v1219_v43 = vsel %vm1164_vm4, %v1218_v11, %v1214_v29  ;;  %v1223_v45 = vrot.slane %v2932_v28, %v2887_v21  ;;  %v1255_v29 = vsub.s32 1, %v2692_v35 }
 0x23a   : > { %v2936_v51 = vpop.xlane.xlu1 %1135  ;;  %v1240_v44 = vsel %vm1239_vm10, %v1219_v43, %v1238_v5  ;;  %v1259_v43 = vsub.s32 2, %v2692_v35 }
 0x23b   : > { %v1227_v36 = vrot.slane %v2936_v51, %v2882_v1 }
 0x23d   : > { %v1228_v56 = vsel %vm1164_vm4, %v1227_v36, %v1223_v45  ;;  %v3236_v45 = vsub.s32 5, %v2692_v35 }
 0x23e   : > { %v1242_v32 = vsel %vm1241_vm11, %v1228_v56, %v1240_v44 }
 0x23f   : > { %v1245_v11 = vsel %vm1244_vm12, %v1242_v32, -inf }
 0x240   : > { %1246 = vmax.xlane.f32.xlu0 %v1245_v11 }
 0x2c9   : > { %v1247_v13 = vpop.xlane.xlu0 %1246 }
 0x2ca   : > { %v1252_v25 = vrot.slane %v1247_v13, %v2705_v48  ;;  %v1256_v12 = vrot.slane %v1247_v13, %v1255_v29  ;;  %v2961_v56 = vrot.slane %v1247_v13, %v3236_v45  ;;  %v1260_v11 = vrot.slane %v1247_v13, %v1259_v43 }
 0x2cc   : > { %v1289_v5 = vsub.f32 %v2862_v16, %v1252_v25  ;;  %v1290_v31 = vsub.f32 %v2866_v55, %v1252_v25  ;;  %v1291_v36 = vsub.f32 %v2864_v33, %v1256_v12  ;;  %v1292_v24 = vsub.f32 %v2868_v23, %v1256_v12 }
 0x2cd   : > { %v1279_v55 = vsub.s32 7, %v2692_v35  ;;  %v1276_v33 = vrot.slane %v1247_v13, %v3235_v10  ;;  %v1299_v25 = vsub.f32 %v2893_v17, %v2961_v56 }
 0x2ce   : > { %v1305_v44 = vmul.f32 1.442695, %v1289_v5  ;;  %v1307_v32 = vmul.f32 1.442695, %v1290_v31  ;;  %v1309_v16 = vmul.f32 1.442695, %v1291_v36  ;;  %v1293_v5 = vsub.f32 %v2870_v7, %v1260_v11 }
 0x2cf   : > { %v1311_v31 = vmul.f32 1.442695, %v1292_v24  ;;  %v1280_v23 = vrot.slane %v1247_v13, %v1279_v55  ;;  %v1301_v12 = vsub.f32 %v2911_v34, %v1276_v33  ;;  %v1325_v36 = vmul.f32 1.442695, %v1299_v25 }
 0x2d0   : > { %2092 = vpow2.f32 %v1305_v44  ;;  %v1264_v44 = vrot.slane %v1247_v13, %v3237_v9  ;;  %v1313_v52 = vmul.f32 1.442695, %v1293_v5  ;;  %v1267_v7 = vsub.s32 4, %v2692_v35 }
 0x2d1   : > { %2094 = vpow2.f32 %v1307_v32  ;;  %v1294_v32 = vsub.f32 %v2872_v42, %v1260_v11  ;;  %v1303_v17 = vsub.f32 %v2932_v28, %v1280_v23  ;;  %v1329_v18 = vmul.f32 1.442695, %v1301_v12 }
 0x2d2   : > { %2096 = vpow2.f32 %v1309_v16  ;;  %v1295_v24 = vsub.f32 %v2879_v57, %v1264_v44  ;;  %v1268_v42 = vrot.slane %v1247_v13, %v1267_v7  ;;  %v1296_v28 = vsub.f32 %v2884_v53, %v1264_v44 }
 0x2d3   : > { %2098 = vpow2.f32 %v1311_v31  ;;  %v1315_v16 = vmul.f32 1.442695, %v1294_v32  ;;  %v1333_v25 = vmul.f32 1.442695, %v1303_v17  ;;  %v1302_v17 = vsub.f32 %v2920_v8, %v1276_v33 }
 0x2d4   : > { %2100 = vpow2.f32 %v1325_v36  ;;  %v1317_v11 = vmul.f32 1.442695, %v1295_v24  ;;  %v1298_v13 = vsub.f32 %v2877_v54, %v1268_v42 }
 0x2d5   : > { %2102 = vpow2.f32 %v1313_v52  ;;  %v1297_v52 = vsub.f32 %v2875_v50, %v1268_v42  ;;  %v1300_v50 = vsub.f32 %v2903_v19, %v2961_v56  ;;  %v1304_v19 = vsub.f32 %v2936_v51, %v1280_v23 }
 0x2d6   : > { %2104 = vpow2.f32 %v1329_v18  ;;  %v1319_v18 = vmul.f32 1.442695, %v1296_v28  ;;  %v1323_v44 = vmul.f32 1.442695, %v1298_v13  ;;  %v1331_v56 = vmul.f32 1.442695, %v1302_v17 }
 0x2d7   : > { %2106 = vpow2.f32 %v1315_v16  ;;  %v1321_v53 = vmul.f32 1.442695, %v1297_v52  ;;  %v1327_v24 = vmul.f32 1.442695, %v1300_v50  ;;  %v1335_v42 = vmul.f32 1.442695, %v1304_v19 }
 0x2d8   : > { %2108 = vpow2.f32 %v1333_v25 }
 0x2d9   : > { %2110 = vpow2.f32 %v1317_v11 }
 0x2da   : > { %2112 = vpow2.f32 %v1319_v18 }
 0x2db   : > { %2114 = vpow2.f32 %v1321_v53 }
 0x2dc   : > { %2116 = vpow2.f32 %v1323_v44 }
 0x2dd   : > { %v2982_v15 = vpop.eup %2092  ;;  %2118 = vpow2.f32 %v1327_v24 }
 0x2de   : > { %v2984_v34 = vpop.eup %2094  ;;  %1354 = vperm.xlu1 %2088, %v2982_v15   ;;  %2120 = vpow2.f32 %v1331_v56 }
 0x2df   : > { %1357 = vperm.xlu0 %2089, %v2984_v34   ;;  %v2991_v57 = vpop.eup %2096  ;;  %2122 = vpow2.f32 %v1335_v42 }
 0x2e0   : > { %v2995_v5 = vpop.eup %2098 }
 0x2e1   : > { %v2998_v31 = vpop.eup %2100 }
 0x2e2   : > { %1360 = vperm.xlu1 %2088, %v2991_v57   ;;  %v3002_v12 = vpop.eup %2102 }
 0x2e3   : > { %1384 = vperm.xlu0 %2089, %v2998_v31   ;;  %v3005_v36 = vpop.eup %2104 }
 0x2e4   : > { %v3010_v32 = vpop.eup %2106 }
 0x2e5   : > { %v3013_v54 = vpop.eup %2108 }
 0x2e6   : > { %1363 = vperm.xlu1 %2088, %v2995_v5   ;;  %v3017_v16 = vpop.eup %2110 }
 0x2e7   : > { %1390 = vperm.xlu0 %2089, %v3005_v36   ;;  %v3021_v25 = vpop.eup %2112 }
 0x2e8   : > { %v3024_v28 = vpop.eup %2114 }
 0x2e9   : > { %v3027_v8 = vpop.eup %2116 }
 0x2ea   : > { %1366 = vperm.xlu1 %2088, %v3002_v12   ;;  %v3030_v33 = vpop.eup %2118 }
 0x2eb   : > { %1396 = vperm.xlu0 %2089, %v3013_v54   ;;  %v3033_v51 = vpop.eup %2120 }
 0x2ec   : > { %v3036_v23 = vpop.eup %2122 }
 0x2ee   : > { %1369 = vperm.xlu1 %2088, %v3010_v32  }
 0x2f2   : > { %1372 = vperm.xlu1 %2088, %v3017_v16  }
 0x2f6   : > { %1375 = vperm.xlu1 %2088, %v3021_v25  }
 0x2fa   : > { %1378 = vperm.xlu1 %2088, %v3024_v28  }
 0x2fe   : > { %1381 = vperm.xlu1 %2088, %v3027_v8  }
 0x302   : > { %1387 = vperm.xlu1 %2088, %v3030_v33  }
 0x306   : > { %1393 = vperm.xlu1 %2088, %v3033_v51  }
 0x30a   : > { %1399 = vperm.xlu1 %2088, %v3036_v23  }
 0x359   : > { %v1355_v11 = vpop.permute.xlu1 %1354 }
 0x35a   : > { %v1358_v44 = vpop.permute.xlu0 %1357  ;;  %v1404_v41 = vrot.slane %v1355_v11, %v2887_v21 }
 0x35b   : > { %v1408_v47 = vrot.slane %v1358_v44, %v2882_v1 }
 0x35d   : > { %v1361_v52 = vpop.permute.xlu1 %1360  ;;  %v1409_v11 = vsel %vm1164_vm4, %v1408_v47, %v1404_v41 }
 0x35e   : > { %v1385_v19 = vpop.permute.xlu0 %1384  ;;  %v1413_v3 = vrot.slane %v1361_v52, %v2887_v21 }
 0x35f   : > { %v1449_v52 = vrot.slane %v1385_v19, %v2887_v21 }
 0x361   : > { %v1364_v18 = vpop.permute.xlu1 %1363 }
 0x362   : > { %v1417_v42 = vrot.slane %v1364_v18, %v2882_v1  ;;  %v1391_v14 = vpop.permute.xlu0 %1390 }
 0x364   : > { %v1418_v10 = vsel %vm1164_vm4, %v1417_v42, %v1413_v3 }
 0x365   : > { %v1367_v13 = vpop.permute.xlu1 %1366  ;;  %v1473_v3 = vsel %vm1229_vm5, %v1418_v10, %v1409_v11 }
 0x366   : > { %v1422_v60 = vrot.slane %v1367_v13, %v2887_v21 }
 0x369   : > { %v1370_v53 = vpop.permute.xlu1 %1369 }
 0x36a   : > { %v1426_v40 = vrot.slane %v1370_v53, %v2882_v1 }
 0x36c   : > { %v1427_v53 = vsel %vm1164_vm4, %v1426_v40, %v1422_v60 }
 0x36d   : > { %v1373_v50 = vpop.permute.xlu1 %1372  ;;  %v1474_v60 = vsel %vm1231_vm6, %v1427_v53, %v1473_v3 }
 0x36e   : > { %v1431_v18 = vrot.slane %v1373_v50, %v2887_v21  ;;  %v1397_v50 = vpop.permute.xlu0 %1396 }
 0x371   : > { %v1376_v17 = vpop.permute.xlu1 %1375 }
 0x372   : > { %v1435_v26 = vrot.slane %v1376_v17, %v2882_v1 }
 0x374   : > { %v1436_v17 = vsel %vm1164_vm4, %v1435_v26, %v1431_v18  ;;  %v1467_v26 = vrot.slane %v1397_v50, %v2887_v21  ;;  %v3261_v50 = vsub.s32 6, %v2692_v35 }
 0x375   : > { %v1379_v24 = vpop.permute.xlu1 %1378 }
 0x376   : > { %v1440_v44 = vrot.slane %v1379_v24, %v2887_v21  ;;  %v1475_v24 = vsel %vm1233_vm7, %v1436_v17, %v1474_v60 }
 0x379   : > { %v1382_v56 = vpop.permute.xlu1 %1381 }
 0x37a   : > { %v1444_v37 = vrot.slane %v1382_v56, %v2882_v1  ;;  %v1458_v56 = vrot.slane %v1391_v14, %v2887_v21 }
 0x37d   : > { %v1388_v62 = vpop.permute.xlu1 %1387 }
 0x37e   : > { %v1453_v45 = vrot.slane %v1388_v62, %v2882_v1  ;;  %v1445_v62 = vsel %vm1164_vm4, %v1444_v37, %v1440_v44 }
 0x380   : > { %v1454_v40 = vsel %vm1164_vm4, %v1453_v45, %v1449_v52 }
 0x381   : > { %v1394_v9 = vpop.permute.xlu1 %1393 }
 0x382   : > { %v1462_v13 = vrot.slane %v1394_v9, %v2882_v1  ;;  %v1476_v9 = vsel %vm1235_vm8, %v1445_v62, %v1475_v24 }
 0x383   : > { %v1477_v10 = vsel %vm1237_vm9, %v1454_v40, %v1476_v9 }
 0x384   : > { %v1463_v47 = vsel %vm1164_vm4, %v1462_v13, %v1458_v56 }
 0x385   : > { %v1400_v41 = vpop.permute.xlu1 %1399  ;;  %v1478_v37 = vsel %vm1239_vm10, %v1463_v47, %v1477_v10 }
 0x386   : > { %v1471_v14 = vrot.slane %v1400_v41, %v2882_v1 }
 0x388   : > { %v1472_v19 = vsel %vm1164_vm4, %v1471_v14, %v1467_v26 }
 0x389   : > { %v1479_v42 = vsel %vm1241_vm11, %v1472_v19, %v1478_v37 }
 0x38a   : > { %v1481_v45 = vsel %vm1244_vm12, %v1479_v42, 0.0  ;;  %v3266_v42 = vmax.f32 %v2786_v27, 0.0 }
 0x38b   : > { %1482 = vadd.xlane.f32.xlu0 %v1481_v45 }
 0x414   : > { %v1483_v18 = vpop.xlane.xlu0 %1482 }
 0x415   : > { %2124 = vrcp.f32 %v1483_v18  ;;  %v3267_v18 = vmax.f32 %v2733_v30, 0.0 }
 0x422   : > { %v2125_v53 = vpop.eup %2124 }
 0x423   : > { %v1505_v21 = vrot.slane %v2125_v53, %v1267_v7  ;;  %v1489_v44 = vrot.slane %v2125_v53, %v2705_v48  ;;  %v1517_v52 = vrot.slane %v2125_v53, %v1279_v55  ;;  %v1493_v56 = vrot.slane %v2125_v53, %v1255_v29 }
 0x424   : > { %v1513_v62 = vrot.slane %v2125_v53, %v3261_v50 }
 0x425   : > { %v1534_v1 = vmul.f32 %v3024_v28, %v1505_v21  ;;  %v1526_v11 = vmul.f32 %v2982_v15, %v1489_v44  ;;  %v1540_v17 = vmul.f32 %v3013_v54, %v1517_v52  ;;  %v1527_v13 = vmul.f32 %v2984_v34, %v1489_v44 }
 0x426   : > { %v1528_v48 = vmul.f32 %v2991_v57, %v1493_v56  ;;  %v1529_v7 = vmul.f32 %v2995_v5, %v1493_v56  ;;  %v1497_v15 = vrot.slane %v2125_v53, %v1259_v43  ;;  %v3259_v34 = vsub.s32 3, %v2692_v35 }
 0x427   : > { %1584 = vperm.xlu0 %2089, %v1534_v1   ;;  %1544 = vperm.xlu1 %2088, %v1526_v11   ;;  %v1535_v5 = vmul.f32 %v3027_v8, %v1505_v21  ;;  %v3260_v43 = vsub.s32 5, %v2692_v35  ;;  %v1541_v8 = vmul.f32 %v3036_v23, %v1517_v52  ;;  %v3262_v35 = vmax.f32 %v2719_v4, 0.0 }
 0x428   : > { %v1530_v55 = vmul.f32 %v3002_v12, %v1497_v15  ;;  %v1531_v54 = vmul.f32 %v3010_v32, %v1497_v15  ;;  %v1501_v28 = vrot.slane %v2125_v53, %v3259_v34  ;;  %v3265_v23 = vmax.f32 %v2712_v61, 0.0 }
 0x429   : > { %v1509_v3 = vrot.slane %v2125_v53, %v3260_v43  ;;  %v3268_v4 = vmax.f32 %v2708_v0, 0.0  ;;  %v3269_v1 = vmax.f32 %v2777_v58, 0.0  ;;  %v3271_v61 = vmax.f32 %v2758_v49, 0.0 }
 0x42a   : > { %v1532_v29 = vmul.f32 %v3017_v16, %v1501_v28  ;;  %v1533_v57 = vmul.f32 %v3021_v25, %v1501_v28  ;;  %v1538_v16 = vmul.f32 %v3005_v36, %v1513_v62  ;;  %v1539_v25 = vmul.f32 %v3033_v51, %v1513_v62 }
 0x42b   : > { %1614 = vperm.xlu0 %2089, %v1540_v17   ;;  %1549 = vperm.xlu1 %2088, %v1527_v13   ;;  %v1536_v12 = vmul.f32 %v2998_v31, %v1509_v3  ;;  %v1537_v32 = vmul.f32 %v3030_v33, %v1509_v3  ;;  %v3263_v36 = vmax.f32 %v2740_v38, 0.0  ;;  %v3264_v51 = vmax.f32 %v2715_v63, 0.0 }
 0x42c   : > { %v3270_v63 = vmax.f32 %v2766_v6, 0.0 }
 0x42f   : > { %1554 = vperm.xlu1 %2088, %v1528_v48  }
 0x433   : > { %1559 = vperm.xlu1 %2088, %v1529_v7  }
 0x437   : > { %1564 = vperm.xlu1 %2088, %v1530_v55  }
 0x43b   : > { %1569 = vperm.xlu1 %2088, %v1531_v54  }
 0x43f   : > { %1574 = vperm.xlu1 %2088, %v1532_v29   ;;  %v3272_v29 = vmax.f32 %v2798_v20, 0.0 }
 0x443   : > { %1579 = vperm.xlu1 %2088, %v1533_v57  }
 0x447   : > { %1589 = vperm.xlu1 %2088, %v1535_v5  }
 0x44b   : > { %1594 = vperm.xlu1 %2088, %v1536_v12   ;;  %v3273_v12 = vmax.f32 %v2808_v39, 0.0 }
 0x44f   : > { %1599 = vperm.xlu1 %2088, %v1537_v32  }
 0x453   : > { %1604 = vperm.xlu1 %2088, %v1538_v16  }
 0x457   : > { %1609 = vperm.xlu1 %2088, %v1539_v25  }
 0x45b   : > { %1619 = vperm.xlu1 %2088, %v1541_v8  }
 0x4a2   : > { %v1545_v60 = vpop.permute.xlu1 %1544  ;;  %v1585_v10 = vpop.permute.xlu0 %1584 }
 0x4a3   : > { %v1622_v44 = vmul.f32 %v1545_v60, %v3268_v4  ;;  %v1630_v17 = vmul.f32 %v1585_v10, %v3271_v61 }
 0x4a5   : > { %v1638_v6 = vsel %vm1088_vm3, %v1622_v44, 0.0  ;;  %v1674_v55 = vsel %vm1088_vm3, %v1630_v17, 0.0 }
 0x4a6   : > { %v1550_v40 = vpop.permute.xlu1 %1549  ;;  %v1615_v39 = vpop.permute.xlu0 %1614 }
 0x4a7   : > { %v1623_v19 = vmul.f32 %v1550_v40, %v3264_v51  ;;  %v3275_v51 = vmax.f32 %v2828_v2, 0.0 }
 0x4a9   : > { %v1639_v30 = vsel %vm1088_vm3, %v1623_v19, 0.0 }
 0x4aa   : > { %v1555_v24 = vpop.permute.xlu1 %1554  ;;  %v1640_v54 = vadd.f32 %v1639_v30, %v1638_v6 }
 0x4ab   : > { %v1624_v37 = vmul.f32 %v1555_v24, %v3265_v23 }
 0x4ac   : > { %v1641_v50 = vrot.slane %v1640_v54, 4 }
 0x4ad   : > { %v1647_v13 = vsel %vm1088_vm3, %v1624_v37, 0.0 }
 0x4ae   : > { %v1560_v31 = vpop.permute.xlu1 %1559 }
 0x4af   : > { %v1625_v9 = vmul.f32 %v1560_v31, %v3262_v35 }
 0x4b1   : > { %v1648_v38 = vsel %vm1088_vm3, %v1625_v9, 0.0 }
 0x4b2   : > { %v1565_v47 = vpop.permute.xlu1 %1564  ;;  %v1649_v56 = vadd.f32 %v1648_v38, %v1647_v13 }
 0x4b3   : > { %v1626_v53 = vmul.f32 %v1565_v47, %v3267_v18  ;;  %v1642_v47 = vadd.f32 %v1641_v50, %v1640_v54 }
 0x4b4   : > { %v1650_v5 = vrot.slane %v1649_v56, 4 }
 0x4b5   : > { %v1656_v48 = vsel %vm1088_vm3, %v1626_v53, 0.0  ;;  %v1643_v23 = vrot.slane %v1642_v47, 2 }
 0x4b6   : > { %v1570_v41 = vpop.permute.xlu1 %1569  ;;  %v1651_v60 = vadd.f32 %v1650_v5, %v1649_v56 }
 0x4b7   : > { %v1627_v14 = vmul.f32 %v1570_v41, %v3263_v36  ;;  %v1644_v2 = vadd.f32 %v1643_v23, %v1642_v47 }
 0x4b8   : > { %v1652_v9 = vrot.slane %v1651_v60, 2 }
 0x4b9   : > { %v1657_v27 = vsel %vm1088_vm3, %v1627_v14, 0.0 }
 0x4ba   : > { %v1575_v33 = vpop.permute.xlu1 %1574  ;;  %v1658_v15 = vadd.f32 %v1657_v27, %v1656_v48 }
 0x4bb   : > { %v1628_v11 = vmul.f32 %v1575_v33, %v3269_v1 }
 0x4bc   : > { %v1659_v3 = vrot.slane %v1658_v15, 4 }
 0x4bd   : > { %v1665_v49 = vsel %vm1088_vm3, %v1628_v11, 0.0  ;;  %v3277_v11 = vmax.f32 %v2842_v22, 0.0 }
 0x4be   : > { %v1580_v26 = vpop.permute.xlu1 %1579  ;;  %v1660_v31 = vadd.f32 %v1659_v3, %v1658_v15 }
 0x4bf   : > { %v1629_v45 = vmul.f32 %v1580_v26, %v3266_v42  ;;  %v3274_v26 = vmax.f32 %v2821_v46, 0.0  ;;  %v3276_v42 = vmax.f32 %v2835_v59, 0.0  ;;  %v1653_v46 = vadd.f32 %v1652_v9, %v1651_v60 }
 0x4c0   : > { %v1661_v10 = vrot.slane %v1660_v31, 2 }
 0x4c1   : > { %v1666_v0 = vsel %vm1088_vm3, %v1629_v45, 0.0  ;;  %v1636_v45 = vmul.f32 %v1615_v39, %v3276_v42  ;;  %v1654_v30 = vrot.slane %v1653_v46, 1 }
 0x4c2   : > { %v1590_v21 = vpop.permute.xlu1 %1589  ;;  %v1667_v34 = vadd.f32 %v1666_v0, %v1665_v49  ;;  %v1662_v1 = vadd.f32 %v1661_v10, %v1660_v31 }
 0x4c3   : > { %v1631_v52 = vmul.f32 %v1590_v21, %v3270_v63  ;;  %v1701_v17 = vsel %vm1088_vm3, %v1636_v45, 0.0  ;;  %v1655_v22 = vadd.f32 %v1654_v30, %v1653_v46 }
 0x4c4   : > { %v1668_v62 = vrot.slane %v1667_v34, 4  ;;  %v1663_v48 = vrot.slane %v1662_v1, 1 }
 0x4c5   : > { %v1675_v58 = vsel %vm1088_vm3, %v1631_v52, 0.0 }
 0x4c6   : > { %v1595_v7 = vpop.permute.xlu1 %1594  ;;  %v1676_v28 = vadd.f32 %v1675_v58, %v1674_v55  ;;  %v1669_v20 = vadd.f32 %v1668_v62, %v1667_v34  ;;  %v1645_v58 = vrot.slane %v1644_v2, 1 }
 0x4c7   : > { %v1632_v57 = vmul.f32 %v1595_v7, %v3272_v29 }
 0x4c8   : > { %v1677_v16 = vrot.slane %v1676_v28, 4  ;;  %v1670_v37 = vrot.slane %v1669_v20, 2  ;;  %v1646_v29 = vadd.f32 %v1645_v58, %v1644_v2 }
 0x4c9   : > { %v1683_v25 = vsel %vm1088_vm3, %v1632_v57, 0.0 }
 0x4ca   : > { %v1600_v43 = vpop.permute.xlu1 %1599  ;;  %v1678_v33 = vadd.f32 %v1677_v16, %v1676_v28  ;;  %v1671_v52 = vadd.f32 %v1670_v37, %v1669_v20  ;;  %v1664_v28 = vadd.f32 %v1663_v48, %v1662_v1 }
 0x4cb   : > { %v1633_v32 = vmul.f32 %v1600_v43, %v3273_v12  ;;  %v1718_v12 = vsel %vm1229_vm5, %v1655_v22, %v1646_v29 }
 0x4cc   : > { %v1679_v18 = vrot.slane %v1678_v33, 2  ;;  %v1672_v7 = vrot.slane %v1671_v52, 1  ;;  %v1719_v62 = vsel %vm1231_vm6, %v1664_v28, %v1718_v12 }
 0x4cd   : > { %v1684_v8 = vsel %vm1088_vm3, %v1633_v32, 0.0 }
 0x4ce   : > { %v1685_v40 = vadd.f32 %v1684_v8, %v1683_v25  ;;  %v1605_v24 = vpop.permute.xlu1 %1604  ;;  %v1680_v59 = vadd.f32 %v1679_v18, %v1678_v33  ;;  %v1673_v57 = vadd.f32 %v1672_v7, %v1671_v52 }
 0x4cf   : > { %v1634_v35 = vmul.f32 %v1605_v24, %v3274_v26 }
 0x4d0   : > { %v1686_v41 = vrot.slane %v1685_v40, 4  ;;  %v1681_v49 = vrot.slane %v1680_v59, 1  ;;  %v1720_v25 = vsel %vm1233_vm7, %v1673_v57, %v1719_v62 }
 0x4d1   : > { %v1692_v53 = vsel %vm1088_vm3, %v1634_v35, 0.0 }
 0x4d2   : > { %v1687_v36 = vadd.f32 %v1686_v41, %v1685_v40  ;;  %v1610_v14 = vpop.permute.xlu1 %1609  ;;  %v1682_v3 = vadd.f32 %v1681_v49, %v1680_v59 }
 0x4d3   : > { %v1635_v19 = vmul.f32 %v1610_v14, %v3275_v51 }
 0x4d4   : > { %v1688_v4 = vrot.slane %v1687_v36, 2  ;;  %v1721_v60 = vsel %vm1235_vm8, %v1682_v3, %v1720_v25 }
 0x4d5   : > { %v1693_v21 = vsel %vm1088_vm3, %v1635_v19, 0.0 }
 0x4d6   : > { %v1694_v44 = vadd.f32 %v1693_v21, %v1692_v53  ;;  %v1620_v38 = vpop.permute.xlu1 %1619  ;;  %v1689_v13 = vadd.f32 %v1688_v4, %v1687_v36 }
 0x4d7   : > { %v1637_v63 = vmul.f32 %v1620_v38, %v3277_v11 }
 0x4d8   : > { %v1695_v61 = vrot.slane %v1694_v44, 4  ;;  %v1690_v55 = vrot.slane %v1689_v13, 1 }
 0x4d9   : > { %v1702_v27 = vsel %vm1088_vm3, %v1637_v63, 0.0 }
 0x4da   : > { %v1696_v0 = vadd.f32 %v1695_v61, %v1694_v44  ;;  %v1703_v56 = vadd.f32 %v1702_v27, %v1701_v17  ;;  %v1691_v32 = vadd.f32 %v1690_v55, %v1689_v13 }
 0x4dc   : > { %v1697_v6 = vrot.slane %v1696_v0, 2  ;;  %v1704_v15 = vrot.slane %v1703_v56, 4  ;;  %v1722_v40 = vsel %vm1237_vm9, %v1691_v32, %v1721_v60 }
 0x4de   : > { %v1698_v54 = vadd.f32 %v1697_v6, %v1696_v0  ;;  %v1705_v34 = vadd.f32 %v1704_v15, %v1703_v56 }
 0x4e0   : > { %v1699_v5 = vrot.slane %v1698_v54, 1  ;;  %v1706_v43 = vrot.slane %v1705_v34, 2 }
 0x4e2   : > { %v1707_v50 = vadd.f32 %v1706_v43, %v1705_v34  ;;  %v1700_v16 = vadd.f32 %v1699_v5, %v1698_v54 }
 0x4e4   : > { %v1708_v8 = vrot.slane %v1707_v50, 1  ;;  %v1723_v31 = vsel %vm1239_vm10, %v1700_v16, %v1722_v40 }
 0x4e6   : > { %v1709_v24 = vadd.f32 %v1708_v8, %v1707_v50 }
 0x4e8   : > { %v1724_v47 = vsel %vm1241_vm11, %v1709_v24, %v1723_v31 }
 0x4e9   : > { %1726 = vst.msk [vmem:[%s333_s20] sm:$0xff] %vm1088_vm3, %v1724_v47 }
 0x4ea   : > { %2247 = shalt.err (!%p2244_p13)
}
 0x4eb   : > { %s2248_s26 = scalar_lea.hbm %s3162_s1, 128  ;;  %s2252_s29 = scalar_lea.hbm %s3207_s6, 256 }
 0x4ec   : > { %p2249_p3 = scmp.ne.s32.totalorder %s3162_s1, %s2248_s26  ;;  %p2253_p11 = scmp.lt.s32.totalorder %s3162_s1, %s3207_s6 }
 0x4ed   : > { %p2254_p1 = scmp.lt.s32.totalorder %s2252_s29, %s2248_s26 }
 0x4ee   : > { %p2250_p10 = pnand %p2249_p3, %p3278_p4 }
 0x4ef   : > { %p2255_p6 = por %p2254_p1, %p2253_p11 }
 0x4f0   : > { %p2251_p2 = pneg %p2250_p10 }
 0x4f2   : > { %p2256_p12 = pnand %p2255_p6, %p2251_p2 }
 0x4f4   : > { %2259 = shalt.err (!%p2256_p12)
}
 0x4f5   : > { %2022 = dma.vmem_to_hbm [thread:$0]  (%p3278_p4), %s1742_s13, 128, %s3162_s1, %s1728_s25  }
 0x4f6 PF: > { %s1753_s9 = sand.u32 1, %s2298_s21   ;;  %p3279_p8 = scmp.ne.s32.totalorder %s3241_s28, 0 }
 0x4f7   : > { %p3280_p7 = scmp.ge.s32.totalorder %s2310_s24, 2  ;;  %s1754_s19 = scalar_lea.sflag [#allocation5], %s1753_s9 }
 0x4f9   : > { %p2039_p0 = pnand %p3280_p7, %p3279_p8 }
 0x4fb   : > { %p2040_p5 = pneg %p2039_p0 }
 0x4fd   : > { %2293 = dma.done.wait (%p2040_p5), %s1754_s19, 128  }
 0x4fe   : > { %2295 = vsyncadd (%p2040_p5), %s1754_s19, 4294967168  ;;  %s3281_s24 = sld [smem:[#allocation16_spill]]  ;;  %s3283_s21 = smov %s2302_s22 }
 0x4ff   : > { %s3282_s10 = sld [smem:[#allocation17_spill]]  ;;  %s3284_s22 = smov %s2306_s23 }
 0x504   : > { %p20_p9 = scmp.ge.s32.totalorder %s3281_s24, 4  }
 0x505   : > { %s3285_s23 = smov %s3282_s10 }
 0x506   :  { %22 = sbr.rel (!%p20_p9) target bundleno = 9 (0x9), region = 110 }
 0x50b   :  { %1759 = vsyncpa [#allocation4], 1 }
 0x50c   :  { %1761 = vsyncpa [#allocation4 + $0x1], 1 }
 0x50d   :  { %1762 = vsyncpa [#allocation7], 1 }
 0x50e   :  { %1763 = vsyncpa [#allocation5], 1 }
 0x50f   :  { %1765 = vsyncpa [#allocation5 + $0x1], 1 }

</bundles_post_ra>
